<compile_context>
chip_gen: v7x
topology: tpu7x:2x2x1
jax: 0.10.0
libtpu: 0.0.40
codegen_flags: <defaults>
</compile_context>

<pallas_src>
import jax
import jax.numpy as jnp
from jax.experimental import pallas as pl
from jax.experimental.pallas import tpu as pltpu  # noqa: F401  (TPU backend)


def _round_up(x, m):
    return (x + m - 1) // m * m


def _pad_to(x, shape):
    return jnp.pad(x, [(0, s - d) for d, s in zip(x.shape, shape)])


def _make_kernel(num_heads, seq_len, u_pad):
    """Builds the kernel body, closed over static sizes.

    num_heads : number of attention heads (static unroll count)
    seq_len   : real (unpadded) context length, for the softmax mask
    u_pad     : padded num_units (lane-aligned), for slicing the hoisted q-term
    """

    def kernel(q_ref, ctx_ref, win_ref, wwc_ref, wx_ref, wqf_ref,
               out_ref, attn_ref):
        q = q_ref[...]                      # (Bp, Up)
        ctx = ctx_ref[...]                  # (Bp, Lp, Mp)
        bp, lp, _ = ctx.shape

        # Mask for the zero-padded context rows (softmax over the real L only).
        valid = jax.lax.broadcasted_iota(jnp.int32, (bp, 1, lp), 2) < seq_len

        # Hoisted constant: the `query` term of every head's output projection,
        # computed once as a single MXU matmul -> (Bp, H*Up).
        qbias = jnp.dot(q, wqf_ref[...], preferred_element_type=jnp.float32)

        x = q                               # chained input_
        attn = None
        for h in range(num_heads):          # heads are sequentially dependent
            # query_proj = linear_ins[h](input_)                   -> (Bp, Mp)
            qproj = jnp.dot(x, win_ref[h], preferred_element_type=jnp.float32)

            # scores = bmm(context, query_proj)   (batched MXU contraction)
            s = jnp.einsum('bqm,blm->bql', qproj[:, None, :], ctx,
                           preferred_element_type=jnp.float32)      # (Bp,1,Lp)
            s = jnp.where(valid, s, jnp.float32(-1e30))

            # softmax over the (real) length dim
            s = s - jnp.max(s, axis=-1, keepdims=True)
            e = jnp.exp(s)
            a = e * pl.reciprocal(jnp.sum(e, axis=-1, keepdims=True),
                                  approx=True)                      # (Bp,1,Lp)

            # wc = bmm(attn, context)             (batched MXU contraction)
            wc = jnp.einsum('bql,blm->bqm', a, ctx,
                            preferred_element_type=jnp.float32)[:, 0, :]

            # cat([wc, input_, query]) @ W_out[h]  == three split matmuls;
            # the query term is the precomputed qbias slice.
            x = jnp.tanh(
                jnp.dot(wc, wwc_ref[h], preferred_element_type=jnp.float32)
                + jnp.dot(x, wx_ref[h], preferred_element_type=jnp.float32)
                + qbias[:, h * u_pad:(h + 1) * u_pad])
            attn = a[:, 0, :]

        out_ref[...] = x                    # final chained input_ ("wc" in torch)
        attn_ref[...] = attn                # last head's attention weights

    return kernel


def dot_product_attention(query, context, w_ins, w_outs):
    """query (B,U), context (B,L,M), w_ins (H,U,M), w_outs (H,M+2U,U)."""
    B, U = query.shape
    _, L, M = context.shape
    H = w_ins.shape[0]

    # Pad sublane dims to multiples of 8 and lane dims to multiples of 128 so
    # every load/store in the kernel is lane-dense (wrapper-side layout only).
    Bp = _round_up(B, 8)
    Up = _round_up(U, 128)
    Mp = _round_up(M, 128)
    Lp = _round_up(L, 128)

    f32 = jnp.float32
    q_p = _pad_to(query.astype(f32), (Bp, Up))
    ctx_p = _pad_to(context.astype(f32), (Bp, Lp, Mp))
    w_in_p = _pad_to(w_ins.astype(f32), (H, Up, Mp))

    # Split the concatenated output projection into its three operands and
    # flatten the (constant) query block into one (Up, H*Up) matrix so the
    # query term is a single in-kernel matmul.
    w_wc_p = _pad_to(w_outs[:, :M, :].astype(f32), (H, Mp, Up))
    w_x_p = _pad_to(w_outs[:, M:M + U, :].astype(f32), (H, Up, Up))
    w_q_p = _pad_to(w_outs[:, M + U:, :].astype(f32), (H, Up, Up))
    w_qf = jnp.transpose(w_q_p, (1, 0, 2)).reshape(Up, H * Up)

    out_p, attn_p = pl.pallas_call(
        _make_kernel(H, L, Up),
        out_shape=(jax.ShapeDtypeStruct((Bp, Up), f32),
                   jax.ShapeDtypeStruct((Bp, Lp), f32)),
        # No grid: single invocation, whole (padded) arrays resident in VMEM
        # (~1.3 MiB total at these sizes).
    )(q_p, ctx_p, w_in_p, w_wc_p, w_x_p, w_qf)

    return out_p[:B, :U], attn_p[:B, :L]


def reference(query, context, w_ins, w_outs):
    """Pure-JAX replica of DotProductAttention.forward (attn_mask=None)."""
    x = query
    attn = None
    for h in range(w_ins.shape[0]):
        qp = x @ w_ins[h]                                         # (B, M)
        scores = jnp.sum(context * qp[:, None, :], axis=-1)       # (B, L)
        attn = jax.nn.softmax(scores, axis=1)
        wc = jnp.sum(attn[:, :, None] * context, axis=1)          # (B, M)
        cat = jnp.concatenate([wc, x, query], axis=1)             # (B, M+2U)
        x = jnp.tanh(cat @ w_outs[h])                             # (B, U)
    return x, attn


if __name__ == "__main__":
    # Small shapes implied by the forward: query (B, U), context (B, L, M).
    B, U, M, L, H = 2, 32, 32, 8, 2

    key = jax.random.PRNGKey(0)
    k_q, k_c, k_win, k_wout = jax.random.split(key, 4)

    query = jax.random.normal(k_q, (B, U), dtype=jnp.float32)
    context = jax.random.normal(k_c, (B, L, M), dtype=jnp.float32)

    # Deterministic parameter init (torch Linear weights, stored pre-transposed).
    w_ins = 0.1 * jax.random.normal(k_win, (H, U, M), dtype=jnp.float32)
    w_outs = 0.1 * jax.random.normal(k_wout, (H, M + 2 * U, U), dtype=jnp.float32)

    wc, attn = dot_product_attention(query, context, w_ins, w_outs)
    jax.block_until_ready((wc, attn))

    wc_ref, attn_ref = reference(query, context, w_ins, w_outs)
    # approx=True reciprocal in the softmax -> slightly looser tolerance.
    assert jnp.allclose(wc, wc_ref, atol=2e-3, rtol=2e-3), "wc mismatch"
    assert jnp.allclose(attn, attn_ref, atol=2e-3, rtol=2e-3), "attn mismatch"

    print("KERNEL_OK")
</pallas_src>

<mosaic_0001>
module attributes {stable_mosaic.version = 11 : i64} {
  func.func @kernel(%arg0: memref<8x128xf32, #tpu.memory_space<vmem>>, %arg1: memref<8x128x128xf32, #tpu.memory_space<vmem>>, %arg2: memref<2x128x128xf32, #tpu.memory_space<vmem>>, %arg3: memref<2x128x128xf32, #tpu.memory_space<vmem>>, %arg4: memref<2x128x128xf32, #tpu.memory_space<vmem>>, %arg5: memref<128x256xf32, #tpu.memory_space<vmem>>, %arg6: memref<8x128xf32, #tpu.memory_space<vmem>>, %arg7: memref<8x128xf32, #tpu.memory_space<vmem>>) attributes {dimension_semantics = [], scalar_prefetch = 0 : i64, scratch_operands = 0 : i64, tpu.core_type = #tpu.core_type<tc>} {
    %c0 = arith.constant 0 : index
    %c0_0 = arith.constant 0 : index
    %0 = vector.load %arg0[%c0, %c0_0] : memref<8x128xf32, #tpu.memory_space<vmem>>, vector<8x128xf32>
    %c0_1 = arith.constant 0 : index
    %c0_2 = arith.constant 0 : index
    %c0_3 = arith.constant 0 : index
    %1 = vector.load %arg1[%c0_1, %c0_2, %c0_3] : memref<8x128x128xf32, #tpu.memory_space<vmem>>, vector<8x128x128xf32>
    %2 = tpu.iota {dimensions = array<i32: 2>} : vector<8x1x128xi32>
    %c8_i32 = arith.constant 8 : i32
    %3 = vector.broadcast %c8_i32 : i32 to vector<8x1x128xi32>
    %4 = arith.cmpi slt, %2, %3 : vector<8x1x128xi32>
    %c0_4 = arith.constant 0 : index
    %c0_5 = arith.constant 0 : index
    %5 = vector.load %arg5[%c0_4, %c0_5] : memref<128x256xf32, #tpu.memory_space<vmem>>, vector<128x256xf32>
    %cst = arith.constant dense<0.000000e+00> : vector<8x256xf32>
    %6 = tpu.matmul %0, %5, %cst {dimension_numbers = #tpu.dot_dimension_numbers<[1], [0], [0], [1], [0, 0, 1, 1], [], []>} : vector<8x128xf32>, vector<128x256xf32>, vector<8x256xf32> -> vector<8x256xf32>
    %c0_6 = arith.constant 0 : index
    %c0_7 = arith.constant 0 : index
    %c0_8 = arith.constant 0 : index
    %7 = vector.load %arg2[%c0_6, %c0_7, %c0_8] : memref<2x128x128xf32, #tpu.memory_space<vmem>>, vector<1x128x128xf32>
    %8 = vector.shape_cast %7 : vector<1x128x128xf32> to vector<128x128xf32>
    %cst_9 = arith.constant dense<0.000000e+00> : vector<8x128xf32>
    %9 = tpu.matmul %0, %8, %cst_9 {dimension_numbers = #tpu.dot_dimension_numbers<[1], [0], [0], [1], [0, 0, 1, 1], [], []>} : vector<8x128xf32>, vector<128x128xf32>, vector<8x128xf32> -> vector<8x128xf32>
    %10 = vector.shape_cast %9 : vector<8x128xf32> to vector<8x1x128xf32>
    "tpu.trace_start"() <{level = 10 : i32, message = "bqm,blm->bql"}> : () -> ()
    %cst_10 = arith.constant dense<0.000000e+00> : vector<8x1x128xf32>
    %11 = tpu.matmul %10, %1, %cst_10 {dimension_numbers = #tpu.dot_dimension_numbers<[2], [2], [1], [1], [0, 0, 0, 1, 1, 1], [0], [0]>} : vector<8x1x128xf32>, vector<8x128x128xf32>, vector<8x1x128xf32> -> vector<8x1x128xf32>
    %cst_11 = arith.constant -1.000000e+30 : f32
    "tpu.trace_stop"() : () -> ()
    %12 = vector.broadcast %cst_11 : f32 to vector<8x1x128xf32>
    %13 = arith.select %4, %11, %12 : vector<8x1x128xi1>, vector<8x1x128xf32>
    %cst_12 = arith.constant dense<0xFF800000> : vector<8x1xf32>
    %14 = vector.multi_reduction <maximumf>, %13, %cst_12 [2] : vector<8x1x128xf32> to vector<8x1xf32>
    %15 = vector.shape_cast %14 : vector<8x1xf32> to vector<8x1x1xf32>
    %16 = vector.broadcast %15 : vector<8x1x1xf32> to vector<8x1x128xf32>
    %17 = arith.subf %13, %16 : vector<8x1x128xf32>
    %18 = math.exp %17 : vector<8x1x128xf32>
    %cst_13 = arith.constant dense<0.000000e+00> : vector<8x1xf32>
    %19 = vector.multi_reduction <add>, %18, %cst_13 [2] : vector<8x1x128xf32> to vector<8x1xf32>
    %20 = vector.shape_cast %19 : vector<8x1xf32> to vector<8x1x1xf32>
    %21 = tpu.reciprocal %20 {approx = true} : vector<8x1x1xf32> -> vector<8x1x1xf32>
    %22 = vector.broadcast %21 : vector<8x1x1xf32> to vector<8x1x128xf32>
    %23 = arith.mulf %18, %22 : vector<8x1x128xf32>
    "tpu.trace_start"() <{level = 10 : i32, message = "bql,blm->bqm"}> : () -> ()
    %cst_14 = arith.constant dense<0.000000e+00> : vector<8x1x128xf32>
    %24 = tpu.matmul %23, %1, %cst_14 {dimension_numbers = #tpu.dot_dimension_numbers<[2], [1], [1], [2], [0, 0, 0, 1, 1, 2], [0], [0]>} : vector<8x1x128xf32>, vector<8x128x128xf32>, vector<8x1x128xf32> -> vector<8x1x128xf32>
    "tpu.trace_stop"() : () -> ()
    %25 = vector.shape_cast %24 : vector<8x1x128xf32> to vector<8x128xf32>
    %c0_15 = arith.constant 0 : index
    %c0_16 = arith.constant 0 : index
    %c0_17 = arith.constant 0 : index
    %26 = vector.load %arg3[%c0_15, %c0_16, %c0_17] : memref<2x128x128xf32, #tpu.memory_space<vmem>>, vector<1x128x128xf32>
    %27 = vector.shape_cast %26 : vector<1x128x128xf32> to vector<128x128xf32>
    %cst_18 = arith.constant dense<0.000000e+00> : vector<8x128xf32>
    %28 = tpu.matmul %25, %27, %cst_18 {dimension_numbers = #tpu.dot_dimension_numbers<[1], [0], [0], [1], [0, 0, 1, 1], [], []>} : vector<8x128xf32>, vector<128x128xf32>, vector<8x128xf32> -> vector<8x128xf32>
    %c0_19 = arith.constant 0 : index
    %c0_20 = arith.constant 0 : index
    %c0_21 = arith.constant 0 : index
    %29 = vector.load %arg4[%c0_19, %c0_20, %c0_21] : memref<2x128x128xf32, #tpu.memory_space<vmem>>, vector<1x128x128xf32>
    %30 = vector.shape_cast %29 : vector<1x128x128xf32> to vector<128x128xf32>
    %cst_22 = arith.constant dense<0.000000e+00> : vector<8x128xf32>
    %31 = tpu.matmul %0, %30, %cst_22 {dimension_numbers = #tpu.dot_dimension_numbers<[1], [0], [0], [1], [0, 0, 1, 1], [], []>} : vector<8x128xf32>, vector<128x128xf32>, vector<8x128xf32> -> vector<8x128xf32>
    %32 = arith.addf %28, %31 : vector<8x128xf32>
    %33 = vector.extract_strided_slice %6 {offsets = [0, 0], sizes = [8, 128], strides = [1, 1]} : vector<8x256xf32> to vector<8x128xf32>
    %34 = arith.addf %32, %33 : vector<8x128xf32>
    %35 = math.tanh %34 : vector<8x128xf32>
    %c1 = arith.constant 1 : index
    %c0_23 = arith.constant 0 : index
    %c0_24 = arith.constant 0 : index
    %36 = vector.load %arg2[%c1, %c0_23, %c0_24] : memref<2x128x128xf32, #tpu.memory_space<vmem>>, vector<1x128x128xf32>
    %37 = vector.shape_cast %36 : vector<1x128x128xf32> to vector<128x128xf32>
    %cst_25 = arith.constant dense<0.000000e+00> : vector<8x128xf32>
    %38 = tpu.matmul %35, %37, %cst_25 {dimension_numbers = #tpu.dot_dimension_numbers<[1], [0], [0], [1], [0, 0, 1, 1], [], []>} : vector<8x128xf32>, vector<128x128xf32>, vector<8x128xf32> -> vector<8x128xf32>
    %39 = vector.shape_cast %38 : vector<8x128xf32> to vector<8x1x128xf32>
    "tpu.trace_start"() <{level = 10 : i32, message = "bqm,blm->bql"}> : () -> ()
    %cst_26 = arith.constant dense<0.000000e+00> : vector<8x1x128xf32>
    %40 = tpu.matmul %39, %1, %cst_26 {dimension_numbers = #tpu.dot_dimension_numbers<[2], [2], [1], [1], [0, 0, 0, 1, 1, 1], [0], [0]>} : vector<8x1x128xf32>, vector<8x128x128xf32>, vector<8x1x128xf32> -> vector<8x1x128xf32>
    %cst_27 = arith.constant -1.000000e+30 : f32
    "tpu.trace_stop"() : () -> ()
    %41 = vector.broadcast %cst_27 : f32 to vector<8x1x128xf32>
    %42 = arith.select %4, %40, %41 : vector<8x1x128xi1>, vector<8x1x128xf32>
    %cst_28 = arith.constant dense<0xFF800000> : vector<8x1xf32>
    %43 = vector.multi_reduction <maximumf>, %42, %cst_28 [2] : vector<8x1x128xf32> to vector<8x1xf32>
    %44 = vector.shape_cast %43 : vector<8x1xf32> to vector<8x1x1xf32>
    %45 = vector.broadcast %44 : vector<8x1x1xf32> to vector<8x1x128xf32>
    %46 = arith.subf %42, %45 : vector<8x1x128xf32>
    %47 = math.exp %46 : vector<8x1x128xf32>
    %cst_29 = arith.constant dense<0.000000e+00> : vector<8x1xf32>
    %48 = vector.multi_reduction <add>, %47, %cst_29 [2] : vector<8x1x128xf32> to vector<8x1xf32>
    %49 = vector.shape_cast %48 : vector<8x1xf32> to vector<8x1x1xf32>
    %50 = tpu.reciprocal %49 {approx = true} : vector<8x1x1xf32> -> vector<8x1x1xf32>
    %51 = vector.broadcast %50 : vector<8x1x1xf32> to vector<8x1x128xf32>
    %52 = arith.mulf %47, %51 : vector<8x1x128xf32>
    "tpu.trace_start"() <{level = 10 : i32, message = "bql,blm->bqm"}> : () -> ()
    %cst_30 = arith.constant dense<0.000000e+00> : vector<8x1x128xf32>
    %53 = tpu.matmul %52, %1, %cst_30 {dimension_numbers = #tpu.dot_dimension_numbers<[2], [1], [1], [2], [0, 0, 0, 1, 1, 2], [0], [0]>} : vector<8x1x128xf32>, vector<8x128x128xf32>, vector<8x1x128xf32> -> vector<8x1x128xf32>
    "tpu.trace_stop"() : () -> ()
    %54 = vector.shape_cast %53 : vector<8x1x128xf32> to vector<8x128xf32>
    %c1_31 = arith.constant 1 : index
    %c0_32 = arith.constant 0 : index
    %c0_33 = arith.constant 0 : index
    %55 = vector.load %arg3[%c1_31, %c0_32, %c0_33] : memref<2x128x128xf32, #tpu.memory_space<vmem>>, vector<1x128x128xf32>
    %56 = vector.shape_cast %55 : vector<1x128x128xf32> to vector<128x128xf32>
    %cst_34 = arith.constant dense<0.000000e+00> : vector<8x128xf32>
    %57 = tpu.matmul %54, %56, %cst_34 {dimension_numbers = #tpu.dot_dimension_numbers<[1], [0], [0], [1], [0, 0, 1, 1], [], []>} : vector<8x128xf32>, vector<128x128xf32>, vector<8x128xf32> -> vector<8x128xf32>
    %c1_35 = arith.constant 1 : index
    %c0_36 = arith.constant 0 : index
    %c0_37 = arith.constant 0 : index
    %58 = vector.load %arg4[%c1_35, %c0_36, %c0_37] : memref<2x128x128xf32, #tpu.memory_space<vmem>>, vector<1x128x128xf32>
    %59 = vector.shape_cast %58 : vector<1x128x128xf32> to vector<128x128xf32>
    %cst_38 = arith.constant dense<0.000000e+00> : vector<8x128xf32>
    %60 = tpu.matmul %35, %59, %cst_38 {dimension_numbers = #tpu.dot_dimension_numbers<[1], [0], [0], [1], [0, 0, 1, 1], [], []>} : vector<8x128xf32>, vector<128x128xf32>, vector<8x128xf32> -> vector<8x128xf32>
    %61 = arith.addf %57, %60 : vector<8x128xf32>
    %62 = vector.extract_strided_slice %6 {offsets = [0, 128], sizes = [8, 128], strides = [1, 1]} : vector<8x256xf32> to vector<8x128xf32>
    %63 = arith.addf %61, %62 : vector<8x128xf32>
    %64 = math.tanh %63 : vector<8x128xf32>
    %65 = vector.shape_cast %52 : vector<8x1x128xf32> to vector<8x128xf32>
    %c0_39 = arith.constant 0 : index
    %c0_40 = arith.constant 0 : index
    %66 = vector.load %arg6[%c0_39, %c0_40] : memref<8x128xf32, #tpu.memory_space<vmem>>, vector<8x128xf32>
    tpu.vector_store %arg6[%c0_39, %c0_40], %64 {strides = array<i32>} : memref<8x128xf32, #tpu.memory_space<vmem>>, vector<8x128xf32>,
    %c0_41 = arith.constant 0 : index
    %c0_42 = arith.constant 0 : index
    %67 = vector.load %arg7[%c0_41, %c0_42] : memref<8x128xf32, #tpu.memory_space<vmem>>, vector<8x128xf32>
    tpu.vector_store %arg7[%c0_41, %c0_42], %65 {strides = array<i32>} : memref<8x128xf32, #tpu.memory_space<vmem>>, vector<8x128xf32>,
    return
  }
}

</mosaic_0001>

<bundles_post_ra>
// kernel: tpu_custom_call.1
= control target key start
LH: loop header
LB: loop body
LE: loop exit
PB: predicated region body
PF: predicated region fallthrough
CT: control target
= control target key end

     0   :  { %13 = vsyncpa [#allocation3], 0  ;;  %s7861_s0 = inlined_call_operand.hbm [shape: f32[8,128], index: 0, kind: input, shape index: {}]   ;;  %s7862_s1 = inlined_call_operand.hbm [shape: f32[8,128,128], index: 1, kind: input, shape index: {}]   ;;  %s7863_s2 = inlined_call_operand.hbm [shape: f32[2,128,128], index: 2, kind: input, shape index: {}]   ;;  %s7864_s3 = inlined_call_operand.hbm [shape: f32[2,128,128], index: 3, kind: input, shape index: {}]   ;;  %s7865_s4 = inlined_call_operand.hbm [shape: f32[2,128,128], index: 4, kind: input, shape index: {}]   ;;  %s7866_s5 = inlined_call_operand.hbm [shape: f32[128,256], index: 5, kind: input, shape index: {}]   ;;  %s7867_s6 = inlined_call_operand.hbm [shape: f32[8,128], index: 6, kind: output, shape index: {0}]   ;;  %s7868_s7 = inlined_call_operand.hbm [shape: f32[8,128], index: 7, kind: output, shape index: {1}]  }
   0x1   :  { %14 = vsyncpa [#allocation6], 0 }
   0x2   :  { %15 = vsyncpa [#allocation9], 0 }
   0x3   :  { %16 = vsyncpa [#allocation12], 0 }
   0x4   :  { %17 = vsyncpa [#allocation4], 0 }
   0x5   :  { %18 = vsyncpa [#allocation15], 0  ;;  %s6721_s24 = smov [#allocation5]   ;;  %s6533_s28 = scalar_lea.hbm %s7862_s1, 16384 }
   0x6   :  { %s34_s25 = sshll.u32 %s6721_s24, 4  ;;  %p6534_p0 = scmp.ne.s32.totalorder %s7862_s1, %s6533_s28  ;;  %s35_s25 = int_to_ptr.vmem [resolvable:$true] %s34_s25 }
   0x7   :  { %p6537_p1 = scmp.lt.u32.totalorder %s6533_s28, %s7862_s1 }
   0x9   :  { %p6539_p2 = pnand %p6537_p1, %p6534_p0 }
   0xb   :  { %6542 = shalt.err (!%p6539_p2)
}
   0xc   :  { %s6543_s10 = scalar_lea.vmem %s35_s25, 16384  ;;  %p6548_p4 = scmp.lt.s32.totalorder %s35_s25, %s35_s25 }
   0xd   :  { %p6544_p3 = scmp.ne.s32.totalorder %s35_s25, %s6543_s10  ;;  %p6549_p5 = scmp.lt.s32.totalorder %s6543_s10, %s6543_s10 }
   0xf   :  { %p6550_p6 = por %p6549_p5, %p6548_p4 }
  0x11   :  { %p6551_p7 = pnand %p6550_p6, %p6544_p3 }
  0x13   :  { %6554 = shalt.err (!%p6551_p7)
}
  0x14   :  { %s6722_s11 = smov 128   ;;  %s6723_s12 = smov 8  }
  0x15   :  { %40 = dma.hbm_to_vmem [thread:$0]  %s7862_s1, 16384, %s35_s25, [#allocation6], %s6722_s11, %s6722_s11, %s6723_s12  }
  0x16   :  { %s6724_s15 = smov [#allocation8]   ;;  %s6725_s17 = smov [#allocation2]  }
  0x17   :  { %s58_s16 = sshll.u32 %s6724_s15, 4  ;;  %s25_s18 = sshll.u32 %s6725_s17, 4  ;;  %s59_s16 = int_to_ptr.vmem [resolvable:$true] %s58_s16  ;;  %s26_s18 = int_to_ptr.vmem [resolvable:$true] %s25_s18 }
  0x18   :  { %s6555_s21 = scalar_lea.hbm %s7864_s3, 4096 }
  0x19   :  { %p6556_p8 = scmp.ne.s32.totalorder %s7864_s3, %s6555_s21  ;;  %p6559_p9 = scmp.lt.u32.totalorder %s6555_s21, %s7864_s3 }
  0x1b   :  { %p6561_p10 = pnand %p6559_p9, %p6556_p8 }
  0x1d   :  { %6564 = shalt.err (!%p6561_p10)
}
  0x1e   :  { %s6565_s1 = scalar_lea.vmem %s59_s16, 4096  ;;  %p6570_p12 = scmp.lt.s32.totalorder %s59_s16, %s59_s16 }
  0x1f   :  { %p6566_p11 = scmp.ne.s32.totalorder %s59_s16, %s6565_s1  ;;  %p6571_p13 = scmp.lt.s32.totalorder %s6565_s1, %s6565_s1 }
  0x21   :  { %p6572_p0 = por %p6571_p13, %p6570_p12 }
  0x23   :  { %p6573_p1 = pnand %p6572_p0, %p6566_p11 }
  0x25   :  { %6576 = shalt.err (!%p6573_p1)
}
  0x26   :  { %64 = dma.hbm_to_vmem [thread:$0]  %s7864_s3, 4096, %s59_s16, [#allocation9], %s6722_s11, %s6722_s11, %s6723_s12  }
  0x27   :  { %s6577_s30 = scalar_lea.hbm %s7861_s0, 128 }
  0x28   :  { %p6578_p2 = scmp.ne.s32.totalorder %s7861_s0, %s6577_s30  ;;  %p6581_p3 = scmp.lt.u32.totalorder %s6577_s30, %s7861_s0 }
  0x2a   :  { %p6583_p4 = pnand %p6581_p3, %p6578_p2 }
  0x2c   :  { %6586 = shalt.err (!%p6583_p4)
}
  0x2d   :  { %s6587_s14 = scalar_lea.vmem %s26_s18, 128  ;;  %p6592_p6 = scmp.lt.s32.totalorder %s26_s18, %s26_s18 }
  0x2e   :  { %p6588_p5 = scmp.ne.s32.totalorder %s26_s18, %s6587_s14  ;;  %p6593_p7 = scmp.lt.s32.totalorder %s6587_s14, %s6587_s14 }
  0x30   :  { %p6594_p8 = por %p6593_p7, %p6592_p6 }
  0x32   :  { %p6595_p9 = pnand %p6594_p8, %p6588_p5 }
  0x34   :  { %6598 = shalt.err (!%p6595_p9)
}
  0x35   :  { %28 = dma.hbm_to_vmem [thread:$0]  %s7861_s0, 128, %s26_s18, [#allocation3]  }
  0x36   :  { %s6726_s16 = smov [#allocation7]   ;;  %s6727_s19 = smov [#allocation10]  }
  0x37   :  { %s46_s17 = sshll.u32 %s6726_s16, 4  ;;  %s70_s20 = sshll.u32 %s6727_s19, 4  ;;  %s47_s17 = int_to_ptr.vmem [resolvable:$true] %s46_s17  ;;  %s71_s20 = int_to_ptr.vmem [resolvable:$true] %s70_s20 }
  0x38   :  { %s6599_s23 = scalar_lea.hbm %s7863_s2, 4096 }
  0x39   :  { %p6600_p10 = scmp.ne.s32.totalorder %s7863_s2, %s6599_s23  ;;  %p6603_p11 = scmp.lt.u32.totalorder %s6599_s23, %s7863_s2 }
  0x3b   :  { %p6605_p12 = pnand %p6603_p11, %p6600_p10 }
  0x3d   :  { %6608 = shalt.err (!%p6605_p12)
}
  0x3e   :  { %s6609_s0 = scalar_lea.vmem %s47_s17, 4096  ;;  %p6614_p0 = scmp.lt.s32.totalorder %s47_s17, %s47_s17 }
  0x3f   :  { %p6610_p13 = scmp.ne.s32.totalorder %s47_s17, %s6609_s0  ;;  %p6615_p1 = scmp.lt.s32.totalorder %s6609_s0, %s6609_s0 }
  0x41   :  { %p6616_p2 = por %p6615_p1, %p6614_p0 }
  0x43   :  { %p6617_p3 = pnand %p6616_p2, %p6610_p13 }
  0x45   :  { %6620 = shalt.err (!%p6617_p3)
}
  0x46   :  { %52 = dma.hbm_to_vmem [thread:$0]  %s7863_s2, 4096, %s47_s17, [#allocation6], %s6722_s11, %s6722_s11, %s6723_s12  }
  0x47   :  { %s6621_s30 = scalar_lea.hbm %s7865_s4, 4096 }
  0x48   :  { %p6622_p4 = scmp.ne.s32.totalorder %s7865_s4, %s6621_s30  ;;  %p6625_p5 = scmp.lt.u32.totalorder %s6621_s30, %s7865_s4 }
  0x4a   :  { %p6627_p6 = pnand %p6625_p5, %p6622_p4 }
  0x4c   :  { %6630 = shalt.err (!%p6627_p6)
}
  0x4d   :  { %s6631_s14 = scalar_lea.vmem %s71_s20, 4096  ;;  %p6636_p8 = scmp.lt.s32.totalorder %s71_s20, %s71_s20 }
  0x4e   :  { %p6632_p7 = scmp.ne.s32.totalorder %s71_s20, %s6631_s14  ;;  %p6637_p9 = scmp.lt.s32.totalorder %s6631_s14, %s6631_s14 }
  0x50   :  { %p6638_p10 = por %p6637_p9, %p6636_p8 }
  0x52   :  { %p6639_p11 = pnand %p6638_p10, %p6632_p7 }
  0x54   :  { %6642 = shalt.err (!%p6639_p11)
}
  0x55   :  { %76 = dma.hbm_to_vmem [thread:$0]  %s7865_s4, 4096, %s71_s20, [#allocation9], %s6722_s11, %s6722_s11, %s6723_s12  }
  0x56   :  { %s6728_s15 = smov [#allocation11]   ;;  %s6643_s21 = scalar_lea.hbm %s7866_s5, 4096 }
  0x57   :  { %s82_s16 = sshll.u32 %s6728_s15, 4  ;;  %p6644_p12 = scmp.ne.s32.totalorder %s7866_s5, %s6643_s21  ;;  %s83_s16 = int_to_ptr.vmem [resolvable:$true] %s82_s16 }
  0x58   :  { %p6647_p13 = scmp.lt.u32.totalorder %s6643_s21, %s7866_s5 }
  0x5a   :  { %p6649_p0 = pnand %p6647_p13, %p6644_p12 }
  0x5c   :  { %6652 = shalt.err (!%p6649_p0)
}
  0x5d   :  { %s6653_s1 = scalar_lea.vmem %s83_s16, 4096  ;;  %p6658_p2 = scmp.lt.s32.totalorder %s83_s16, %s83_s16 }
  0x5e   :  { %p6654_p1 = scmp.ne.s32.totalorder %s83_s16, %s6653_s1  ;;  %p6659_p3 = scmp.lt.s32.totalorder %s6653_s1, %s6653_s1 }
  0x60   :  { %p6660_p4 = por %p6659_p3, %p6658_p2 }
  0x62   :  { %p6661_p5 = pnand %p6660_p4, %p6654_p1 }
  0x64   :  { %6664 = shalt.err (!%p6661_p5)
}
  0x65   :  { %s6729_s4 = smov 256   ;;  %s6730_s11 = smov 16  }
  0x66   :  { %88 = dma.hbm_to_vmem [thread:$0]  %s7866_s5, 4096, %s83_s16, [#allocation12], %s6729_s4, %s6729_s4, %s6730_s11  }
  0x67   :  { %6709 = dma.done.wait [#allocation3], 128  }
  0x68   :  { %6710 = vsyncadd [#allocation3], 4294967168 }
  0x69   :  { %6711 = dma.done.wait [#allocation6], 20480  }
  0x6a   :  { %6712 = vsyncadd [#allocation6], 4294946816 }
  0x6b   :  { %6713 = dma.done.wait [#allocation9], 8192  }
  0x6c   :  { %6714 = vsyncadd [#allocation9], 4294959104 }
  0x6d   :  { %6715 = dma.done.wait [#allocation12], 4096  }
  0x6e   :  { %6716 = vsyncadd [#allocation12], 4294963200  ;;  %v7902_v0 = vmov 0.0|0.0   ;;  %vm6732_vm0 = vmmov 0   ;;  %v7870_v1 = vmov 0.0   ;;  %v342_v2 = vld [vmem:[#allocation7] sm:$0xff] }
  0x6f   :  { %5532 = vmatprep.subr.bf16.mxu1 %v7902_v0  ;;  %4202 = vmatprep.mubr.msk.f32.mxu1 %vm6732_vm0, %v7870_v1  ;;  %v343_v3 = vld [vmem:[#allocation7 + $0x8] sm:$0xff]  ;;  %v344_v4 = vld [vmem:[#allocation7 + $0x10] sm:$0xff]  ;;  %v345_v6 = vld [vmem:[#allocation7 + $0x18] sm:$0xff]  ;;  %vm1054_vm2 = vcmask 1040384   ;;  %vm1814_vm3 = vcmask 1041409   ;;  %vm1817_vm4 = vcmask 1042434  }
  0x70   :  { %335 = vmatprep.mubr.f32.mxu0 %v7870_v1  ;;  %v5533_v5 = vpack.c.bf16 %v343_v3, %v342_v2  ;;  %v5536_v7 = vpack.c.bf16 %v345_v6, %v344_v4  ;;  %v346_v8 = vld [vmem:[#allocation7 + $0x20] sm:$0xff]  ;;  %v347_v9 = vld [vmem:[#allocation7 + $0x28] sm:$0xff]  ;;  %v348_v11 = vld [vmem:[#allocation7 + $0x30] sm:$0xff]  ;;  %vm1820_vm5 = vcmask 1043459   ;;  %vm1823_vm6 = vcmask 1044484   ;;  %s6735_s5 = smov [#allocation14]  }
  0x71   :  { %v240_v10 = vld [vmem:[#allocation11 + $0x8] sm:$0xff]  ;;  %v349_v12 = vld [vmem:[#allocation7 + $0x38] sm:$0xff]  ;;  %v239_v14 = vld [vmem:[#allocation11] sm:$0xff]  ;;  %v5539_v16 = vpack.c.bf16 %v347_v9, %v346_v8  ;;  %vm1826_vm7 = vcmask 1045509   ;;  %vm1829_vm8 = vcmask 1046534   ;;  %vm1832_vm9 = vcmask 1047559  }
  0x72   :  { %5534 = vmatpush3.bf16.msra.mxu1 %v5533_v5  ;;  %v242_v13 = vld [vmem:[#allocation11 + $0x18] sm:$0xff]  ;;  %v241_v15 = vld [vmem:[#allocation11 + $0x10] sm:$0xff]  ;;  %v244_v19 = vld [vmem:[#allocation11 + $0x28] sm:$0xff]  ;;  %v5542_v27 = vpack.c.bf16 %v349_v12, %v348_v11  ;;  %s3508_s25 = sshll.u32 %s6735_s5, 4  ;;  %s3509_s25 = int_to_ptr.vmem [resolvable:$true] %s3508_s25 }
  0x73   :  { %5535 = vmatprep.subr.bf16.mxu1 %v7902_v0  ;;  %v5500_v17 = vpack.c.bf16 %v242_v13, %v240_v10  ;;  %v5502_v18 = vpack.c.bf16 %v241_v15, %v239_v14  ;;  %v246_v20 = vld [vmem:[#allocation11 + $0x38] sm:$0xff]  ;;  %v243_v21 = vld [vmem:[#allocation11 + $0x20] sm:$0xff]  ;;  %v245_v23 = vld [vmem:[#allocation11 + $0x30] sm:$0xff]  ;;  %s6665_s0 = scalar_lea.vmem %s3509_s25, 128  ;;  %p6670_p7 = scmp.lt.s32.totalorder %s3509_s25, %s3509_s25 }
  0x74   :  { %v5504_v22 = vpack.c.bf16 %v246_v20, %v244_v19  ;;  %v248_v24 = vld [vmem:[#allocation11 + $0x48] sm:$0xff]  ;;  %v250_v25 = vld [vmem:[#allocation11 + $0x58] sm:$0xff]  ;;  %v5506_v26 = vpack.c.bf16 %v245_v23, %v243_v21  ;;  %v350_v28 = vld [vmem:[#allocation7 + $0x40] sm:$0xff]  ;;  %p6666_p6 = scmp.ne.s32.totalorder %s3509_s25, %s6665_s0  ;;  %p6671_p8 = scmp.lt.s32.totalorder %s6665_s0, %s6665_s0 }
  0x75   :  { %5501 = vmatprep.subr.bf16.mxu0 %v5500_v17  ;;  %v5508_v29 = vpack.c.bf16 %v250_v25, %v248_v24  ;;  %v247_v30 = vld [vmem:[#allocation11 + $0x40] sm:$0xff]  ;;  %v249_v31 = vld [vmem:[#allocation11 + $0x50] sm:$0xff]  ;;  %v351_v32 = vld [vmem:[#allocation7 + $0x48] sm:$0xff] }
  0x76   :  { %5537 = vmatpush3.bf16.msra.mxu1 %v5536_v7  ;;  %5503 = vmatpush1.bf16.msra.mxu0 %v5502_v18  ;;  %v252_v33 = vld [vmem:[#allocation11 + $0x68] sm:$0xff]  ;;  %v254_v34 = vld [vmem:[#allocation11 + $0x78] sm:$0xff]  ;;  %v5510_v35 = vpack.c.bf16 %v249_v31, %v247_v30  ;;  %v5545_v36 = vpack.c.bf16 %v351_v32, %v350_v28  ;;  %v352_v37 = vld [vmem:[#allocation7 + $0x50] sm:$0xff]  ;;  %p6672_p9 = por %p6671_p8, %p6670_p7 }
  0x77   :  { %5538 = vmatprep.subr.bf16.mxu1 %v7902_v0  ;;  %5505 = vmatprep.subr.bf16.mxu0 %v5504_v22  ;;  %v5512_v38 = vpack.c.bf16 %v254_v34, %v252_v33  ;;  %v251_v39 = vld [vmem:[#allocation11 + $0x60] sm:$0xff]  ;;  %v253_v40 = vld [vmem:[#allocation11 + $0x70] sm:$0xff]  ;;  %v353_v41 = vld [vmem:[#allocation7 + $0x58] sm:$0xff] }
  0x78   :  { %v256_v42 = vld [vmem:[#allocation11 + $0x88] sm:$0xff]  ;;  %v258_v43 = vld [vmem:[#allocation11 + $0x98] sm:$0xff]  ;;  %v5514_v44 = vpack.c.bf16 %v253_v40, %v251_v39  ;;  %v5548_v45 = vpack.c.bf16 %v353_v41, %v352_v37  ;;  %v354_v46 = vld [vmem:[#allocation7 + $0x60] sm:$0xff]  ;;  %p6673_p10 = pnand %p6672_p9, %p6666_p6 }
  0x79   :  { %v5516_v47 = vpack.c.bf16 %v258_v43, %v256_v42  ;;  %v255_v48 = vld [vmem:[#allocation11 + $0x80] sm:$0xff]  ;;  %v257_v49 = vld [vmem:[#allocation11 + $0x90] sm:$0xff]  ;;  %v355_v50 = vld [vmem:[#allocation7 + $0x68] sm:$0xff] }
  0x7a   :  { %5540 = vmatpush3.bf16.msra.mxu1 %v5539_v16  ;;  %5507 = vmatpush1.bf16.msra.mxu0 %v5506_v26  ;;  %v260_v51 = vld [vmem:[#allocation11 + $0xa8] sm:$0xff]  ;;  %v262_v52 = vld [vmem:[#allocation11 + $0xb8] sm:$0xff]  ;;  %v5518_v53 = vpack.c.bf16 %v257_v49, %v255_v48  ;;  %v5551_v54 = vpack.c.bf16 %v355_v50, %v354_v46  ;;  %v356_v55 = vld [vmem:[#allocation7 + $0x70] sm:$0xff] }
  0x7b   :  { %5541 = vmatprep.subr.bf16.mxu1 %v7902_v0  ;;  %5509 = vmatprep.subr.bf16.mxu0 %v5508_v29  ;;  %v5520_v56 = vpack.c.bf16 %v262_v52, %v260_v51  ;;  %v259_v57 = vld [vmem:[#allocation11 + $0xa0] sm:$0xff]  ;;  %v261_v58 = vld [vmem:[#allocation11 + $0xb0] sm:$0xff]  ;;  %v357_v59 = vld [vmem:[#allocation7 + $0x78] sm:$0xff] }
  0x7c   :  { %v264_v60 = vld [vmem:[#allocation11 + $0xc8] sm:$0xff]  ;;  %v266_v61 = vld [vmem:[#allocation11 + $0xd8] sm:$0xff]  ;;  %v5522_v62 = vpack.c.bf16 %v261_v58, %v259_v57  ;;  %v5554_v63 = vpack.c.bf16 %v357_v59, %v356_v55  ;;  %v263_v3 = vld [vmem:[#allocation11 + $0xc0] sm:$0xff] }
  0x7d   :  { %v5524_v2 = vpack.c.bf16 %v266_v61, %v264_v60  ;;  %v265_v4 = vld [vmem:[#allocation11 + $0xd0] sm:$0xff]  ;;  %v268_v5 = vld [vmem:[#allocation11 + $0xe8] sm:$0xff]  ;;  %v270_v6 = vld [vmem:[#allocation11 + $0xf8] sm:$0xff]  ;;  %v7869_v61 = vlaneseq }
  0x7e   :  { %5543 = vmatpush3.bf16.msra.mxu1 %v5542_v27  ;;  %5511 = vmatpush1.bf16.msra.mxu0 %v5510_v35  ;;  %v5526_v7 = vpack.c.bf16 %v265_v4, %v263_v3  ;;  %v107_v8 = vld [vmem:[#allocation2] sm:$0xff]  ;;  %v5528_v9 = vpack.c.bf16 %v270_v6, %v268_v5  ;;  %v267_v10 = vld [vmem:[#allocation11 + $0xe0] sm:$0xff]  ;;  %v269_v11 = vld [vmem:[#allocation11 + $0xf0] sm:$0xff] }
  0x7f   :  { %5544 = vmatprep.subr.bf16.mxu1 %v7902_v0  ;;  %5513 = vmatprep.subr.bf16.mxu0 %v5512_v38  ;;  %v124_v12 = vld [vmem:[#allocation5 + $0x80] sm:$0xff]  ;;  %v125_v13 = vld [vmem:[#allocation5 + $0x88] sm:$0xff]  ;;  %v5530_v14 = vpack.c.bf16 %v269_v11, %v267_v10  ;;  %v126_v18 = vld [vmem:[#allocation5 + $0x90] sm:$0xff]  ;;  %v434_v3 = vshrl.u32 %v7869_v61, 7 }
  0x80   :  { %v6875_v15 = vpack.c.bf16 %v125_v13, %v124_v12  ;;  %v108_v16 = vld [vmem:[#allocation5] sm:$0xff]  ;;  %v109_v17 = vld [vmem:[#allocation5 + $0x8] sm:$0xff]  ;;  %v127_v19 = vld [vmem:[#allocation5 + $0x98] sm:$0xff] }
  0x81   :  { %v6882_v20 = vpack.c.bf16 %v109_v17, %v108_v16  ;;  %v6884_v21 = vpack.c.bf16 %v127_v19, %v126_v18  ;;  %v110_v22 = vld [vmem:[#allocation5 + $0x10] sm:$0xff]  ;;  %v111_v23 = vld [vmem:[#allocation5 + $0x18] sm:$0xff]  ;;  %v128_v24 = vld [vmem:[#allocation5 + $0xa0] sm:$0xff] }
  0x82   :  { %5546 = vmatpush3.bf16.msra.mxu1 %v5545_v36  ;;  %5515 = vmatpush1.bf16.msra.mxu0 %v5514_v44  ;;  %v129_v25 = vld [vmem:[#allocation5 + $0xa8] sm:$0xff]  ;;  %v6890_v26 = vpack.c.bf16 %v111_v23, %v110_v22  ;;  %v112_v28 = vld [vmem:[#allocation5 + $0x20] sm:$0xff]  ;;  %v130_v30 = vld [vmem:[#allocation5 + $0xb0] sm:$0xff] }
  0x83   :  { %5547 = vmatprep.subr.bf16.mxu1 %v7902_v0  ;;  %5517 = vmatprep.subr.bf16.mxu0 %v5516_v47  ;;  %7929 = vst [vmem:[#allocation22_spill] sm:$0xff] %v6882_v20  ;;  %v6892_v27 = vpack.c.bf16 %v129_v25, %v128_v24  ;;  %v113_v29 = vld [vmem:[#allocation5 + $0x28] sm:$0xff]  ;;  %v131_v31 = vld [vmem:[#allocation5 + $0xb8] sm:$0xff]  ;;  %v114_v34 = vld [vmem:[#allocation5 + $0x30] sm:$0xff] }
  0x84   :  { %7930 = vst [vmem:[#allocation23_spill] sm:$0xff] %v6890_v26  ;;  %v6898_v32 = vpack.c.bf16 %v113_v29, %v112_v28  ;;  %v6900_v33 = vpack.c.bf16 %v131_v31, %v130_v30  ;;  %v115_v35 = vld [vmem:[#allocation5 + $0x38] sm:$0xff]  ;;  %v132_v36 = vld [vmem:[#allocation5 + $0xc0] sm:$0xff]  ;;  %v133_v37 = vld [vmem:[#allocation5 + $0xc8] sm:$0xff] }
  0x85   :  { %v6906_v38 = vpack.c.bf16 %v115_v35, %v114_v34  ;;  %v6908_v39 = vpack.c.bf16 %v133_v37, %v132_v36  ;;  %v116_v40 = vld [vmem:[#allocation5 + $0x40] sm:$0xff]  ;;  %v117_v41 = vld [vmem:[#allocation5 + $0x48] sm:$0xff]  ;;  %v134_v42 = vld [vmem:[#allocation5 + $0xd0] sm:$0xff] }
  0x86   :  { %5549 = vmatpush3.bf16.msra.mxu1 %v5548_v45  ;;  %5519 = vmatpush1.bf16.msra.mxu0 %v5518_v53  ;;  %7931 = vst [vmem:[#allocation24_spill] sm:$0xff] %v6898_v32  ;;  %v135_v43 = vld [vmem:[#allocation5 + $0xd8] sm:$0xff]  ;;  %v6914_v44 = vpack.c.bf16 %v117_v41, %v116_v40  ;;  %v118_v46 = vld [vmem:[#allocation5 + $0x50] sm:$0xff]  ;;  %v136_v48 = vld [vmem:[#allocation5 + $0xe0] sm:$0xff] }
  0x87   :  { %5550 = vmatprep.subr.bf16.mxu1 %v7902_v0  ;;  %5521 = vmatprep.subr.bf16.mxu0 %v5520_v56  ;;  %7932 = vst [vmem:[#allocation25_spill] sm:$0xff] %v6906_v38  ;;  %v6916_v45 = vpack.c.bf16 %v135_v43, %v134_v42  ;;  %v119_v47 = vld [vmem:[#allocation5 + $0x58] sm:$0xff]  ;;  %v137_v49 = vld [vmem:[#allocation5 + $0xe8] sm:$0xff]  ;;  %v120_v52 = vld [vmem:[#allocation5 + $0x60] sm:$0xff] }
  0x88   :  { %7933 = vst [vmem:[#allocation26_spill] sm:$0xff] %v6914_v44  ;;  %v6922_v50 = vpack.c.bf16 %v119_v47, %v118_v46  ;;  %v6924_v51 = vpack.c.bf16 %v137_v49, %v136_v48  ;;  %v121_v53 = vld [vmem:[#allocation5 + $0x68] sm:$0xff]  ;;  %v139_v55 = vld [vmem:[#allocation5 + $0xf8] sm:$0xff]  ;;  %v122_v58 = vld [vmem:[#allocation5 + $0x70] sm:$0xff] }
  0x89   :  { %v6930_v56 = vpack.c.bf16 %v121_v53, %v120_v52  ;;  %v123_v59 = vld [vmem:[#allocation5 + $0x78] sm:$0xff]  ;;  %v140_v5 = vld [vmem:[#allocation5 + $0x100] sm:$0xff]  ;;  %v141_v6 = vld [vmem:[#allocation5 + $0x108] sm:$0xff] }
  0x8a   :  { %5552 = vmatpush3.bf16.msra.mxu1 %v5551_v54  ;;  %5523 = vmatpush1.bf16.msra.mxu0 %v5522_v62  ;;  %7934 = vst [vmem:[#allocation27_spill] sm:$0xff] %v6922_v50  ;;  %v138_v54 = vld [vmem:[#allocation5 + $0xf0] sm:$0xff]  ;;  %v6938_v60 = vpack.c.bf16 %v123_v59, %v122_v58  ;;  %v6734_v62 = vmov 1966171168   ;;  %v156_v10 = vld [vmem:[#allocation5 + $0x180] sm:$0xff]  ;;  %v157_v11 = vld [vmem:[#allocation5 + $0x188] sm:$0xff]  ;;  %v6949_v12 = vpack.c.bf16 %v141_v6, %v140_v5 }
  0x8b   :  { %5553 = vmatprep.subr.bf16.mxu1 %v7902_v0  ;;  %5525 = vmatprep.subr.bf16.mxu0 %v5524_v2  ;;  %7935 = vst [vmem:[#allocation28_spill] sm:$0xff] %v6930_v56  ;;  %v6932_v57 = vpack.c.bf16 %v139_v55, %v138_v54  ;;  %v6954_v16 = vpack.c.bf16 %v157_v11, %v156_v10  ;;  %v142_v18 = vld [vmem:[#allocation5 + $0x110] sm:$0xff]  ;;  %v143_v19 = vld [vmem:[#allocation5 + $0x118] sm:$0xff]  ;;  %v144_v28 = vld [vmem:[#allocation5 + $0x120] sm:$0xff] }
  0x8c   :  { %7937 = vst [vmem:[#allocation30_spill] sm:$0xff] %v6938_v60  ;;  %v158_v22 = vld [vmem:[#allocation5 + $0x190] sm:$0xff]  ;;  %v159_v23 = vld [vmem:[#allocation5 + $0x198] sm:$0xff]  ;;  %v6969_v24 = vpack.c.bf16 %v143_v19, %v142_v18  ;;  %v145_v29 = vld [vmem:[#allocation5 + $0x128] sm:$0xff] }
  0x8d   :  { %7936 = vst [vmem:[#allocation29_spill] sm:$0xff] %v6932_v57  ;;  %v6971_v25 = vpack.c.bf16 %v159_v23, %v158_v22  ;;  %v160_v30 = vld [vmem:[#allocation5 + $0x1a0] sm:$0xff]  ;;  %v161_v31 = vld [vmem:[#allocation5 + $0x1a8] sm:$0xff]  ;;  %v6977_v34 = vpack.c.bf16 %v145_v29, %v144_v28  ;;  %v146_v36 = vld [vmem:[#allocation5 + $0x130] sm:$0xff] }
  0x8e   :  { %5555 = vmatpush3.bf16.msra.mxu1 %v5554_v63  ;;  %5527 = vmatpush1.bf16.msra.mxu0 %v5526_v7  ;;  %v431_v63 = vunpack.c.l.s4 %v6734_v62  ;;  %v6979_v35 = vpack.c.bf16 %v161_v31, %v160_v30  ;;  %v147_v37 = vld [vmem:[#allocation5 + $0x138] sm:$0xff]  ;;  %v162_v41 = vld [vmem:[#allocation5 + $0x1b0] sm:$0xff]  ;;  %v148_v48 = vld [vmem:[#allocation5 + $0x140] sm:$0xff] }
  0x8f   :  { %5580 = vmatprep.subr.bf16.mxu1 %v7902_v0  ;;  %5529 = vmatprep.subr.bf16.mxu0 %v5528_v9  ;;  %v163_v42 = vld [vmem:[#allocation5 + $0x1b8] sm:$0xff]  ;;  %v6989_v46 = vpack.c.bf16 %v147_v37, %v146_v36  ;;  %v149_v49 = vld [vmem:[#allocation5 + $0x148] sm:$0xff]  ;;  %v164_v52 = vld [vmem:[#allocation5 + $0x1c0] sm:$0xff] }
  0x90   :  { %v432_v2 = vunpack.c.0.s8 %v431_v63  ;;  %v6991_v47 = vpack.c.bf16 %v163_v42, %v162_v41  ;;  %v165_v53 = vld [vmem:[#allocation5 + $0x1c8] sm:$0xff]  ;;  %v6997_v54 = vpack.c.bf16 %v149_v49, %v148_v48  ;;  %v150_v58 = vld [vmem:[#allocation5 + $0x150] sm:$0xff]  ;;  %v151_v59 = vld [vmem:[#allocation5 + $0x158] sm:$0xff] }
  0x91   :  { %4203 = vmatmul.mubr.f32.vlgmr.msra.gmra.mrb[0].mxu1 %v107_v8  ;;  %v6999_v55 = vpack.c.bf16 %v165_v53, %v164_v52  ;;  %v166_v62 = vld [vmem:[#allocation5 + $0x1d0] sm:$0xff]  ;;  %v167_v63 = vld [vmem:[#allocation5 + $0x1d8] sm:$0xff]  ;;  %v152_v5 = vld [vmem:[#allocation5 + $0x160] sm:$0xff] }
  0x92   :  { %4272 = vmatprep.mubr.msk.f32.mxu1 %vm6732_vm0, %v7870_v1  ;;  %5531 = vmatpush1.bf16.msra.mxu0 %v5530_v14  ;;  %v6943_v4 = vsub.s32 %v432_v2, %v434_v3  ;;  %v7005_v2 = vpack.c.bf16 %v151_v59, %v150_v58  ;;  %v7007_v3 = vpack.c.bf16 %v167_v63, %v166_v62  ;;  %v153_v6 = vld [vmem:[#allocation5 + $0x168] sm:$0xff]  ;;  %v155_v18 = vld [vmem:[#allocation5 + $0x178] sm:$0xff]  ;;  %v170_v19 = vld [vmem:[#allocation5 + $0x1f0] sm:$0xff] }
  0x93   :  { %5556 = vmatprep.subr.bf16.mxu0 %v7902_v0  ;;  %v7013_v10 = vpack.c.bf16 %v153_v6, %v152_v5  ;;  %v171_v22 = vld [vmem:[#allocation5 + $0x1f8] sm:$0xff]  ;;  %v172_v29 = vld [vmem:[#allocation5 + $0x200] sm:$0xff]  ;;  %v173_v30 = vld [vmem:[#allocation5 + $0x208] sm:$0xff] }
  0x94   :  { %7938 = vst [vmem:[#allocation31_spill] sm:$0xff] %v6943_v4  ;;  %v7023_v28 = vpack.c.bf16 %v171_v22, %v170_v19  ;;  %v188_v31 = vld [vmem:[#allocation5 + $0x280] sm:$0xff]  ;;  %v189_v36 = vld [vmem:[#allocation5 + $0x288] sm:$0xff]  ;;  %v7029_v37 = vpack.c.bf16 %v173_v30, %v172_v29  ;;  %v174_v49 = vld [vmem:[#allocation5 + $0x210] sm:$0xff] }
  0x95   :  { %336 = vmatmul.mubr.f32.vlgmr.msra.gmra.mrb[0].mxu0 %v107_v8  ;;  %v7033_v42 = vpack.c.bf16 %v189_v36, %v188_v31  ;;  %v175_v52 = vld [vmem:[#allocation5 + $0x218] sm:$0xff]  ;;  %v176_v59 = vld [vmem:[#allocation5 + $0x220] sm:$0xff]  ;;  %v177_v62 = vld [vmem:[#allocation5 + $0x228] sm:$0xff] }
  0x96   :  { %4237 = vmatprep.mubr.msk.f32.mxu0 %vm6732_vm0, %v7870_v1  ;;  %v191_v53 = vld [vmem:[#allocation5 + $0x298] sm:$0xff]  ;;  %v192_v63 = vld [vmem:[#allocation5 + $0x2a0] sm:$0xff]  ;;  %v193_v5 = vld [vmem:[#allocation5 + $0x2a8] sm:$0xff]  ;;  %v7053_v6 = vpack.c.bf16 %v177_v62, %v176_v59 }
  0x97   :  { %5582 = vmatpush3.bf16.xpose.msra.mxu1 %v6875_v15  ;;  %v195_v19 = vld [vmem:[#allocation5 + $0x2b8] sm:$0xff]  ;;  %v180_v30 = vld [vmem:[#allocation5 + $0x240] sm:$0xff]  ;;  %v181_v31 = vld [vmem:[#allocation5 + $0x248] sm:$0xff] }
  0x98   :  { %5583 = vmatprep.subr.bf16.mxu1 %v7902_v0  ;;  %v196_v36 = vld [vmem:[#allocation5 + $0x2c0] sm:$0xff]  ;;  %v199_v59 = vld [vmem:[#allocation5 + $0x2d8] sm:$0xff]  ;;  %v221_v61 = vld [vmem:[#allocation5 + $0x388] sm:$0xff] }
  0x9b   :  { %5558 = vmatpush3.bf16.xpose.msra.mxu0 %v6882_v20 }
  0x9c   :  { %5559 = vmatprep.subr.bf16.mxu0 %v7902_v0 }
  0x9f   :  { %5585 = vmatpush3.bf16.xpose.msra.mxu1 %v6884_v21 }
  0xa0   :  { %5586 = vmatprep.subr.bf16.mxu1 %v7902_v0 }
  0xa3   :  { %5561 = vmatpush3.bf16.xpose.msra.mxu0 %v6890_v26 }
  0xa4   :  { %5562 = vmatprep.subr.bf16.mxu0 %v7902_v0 }
  0xa7   :  { %5588 = vmatpush3.bf16.xpose.msra.mxu1 %v6892_v27 }
  0xa8   :  { %5589 = vmatprep.subr.bf16.mxu1 %v7902_v0 }
  0xab   :  { %5564 = vmatpush3.bf16.xpose.msra.mxu0 %v6898_v32 }
  0xac   :  { %5565 = vmatprep.subr.bf16.mxu0 %v7902_v0 }
  0xaf   :  { %5591 = vmatpush3.bf16.xpose.msra.mxu1 %v6900_v33 }
  0xb0   :  { %5592 = vmatprep.subr.bf16.mxu1 %v7902_v0 }
  0xb3   :  { %5567 = vmatpush3.bf16.xpose.msra.mxu0 %v6906_v38 }
  0xb4   :  { %5568 = vmatprep.subr.bf16.mxu0 %v7902_v0 }
  0xb7   :  { %5594 = vmatpush3.bf16.xpose.msra.mxu1 %v6908_v39 }
  0xb8   :  { %5595 = vmatprep.subr.bf16.mxu1 %v7902_v0 }
  0xbb   :  { %5570 = vmatpush3.bf16.xpose.msra.mxu0 %v6914_v44 }
  0xbc   :  { %5571 = vmatprep.subr.bf16.mxu0 %v7902_v0 }
  0xbf   :  { %5597 = vmatpush3.bf16.xpose.msra.mxu1 %v6916_v45 }
  0xc0   :  { %5598 = vmatprep.subr.bf16.mxu1 %v7902_v0 }
  0xc3   :  { %5573 = vmatpush3.bf16.xpose.msra.mxu0 %v6922_v50 }
  0xc4   :  { %5574 = vmatprep.subr.bf16.mxu0 %v7902_v0 }
  0xc7   :  { %5600 = vmatpush3.bf16.xpose.msra.mxu1 %v6924_v51 }
  0xc8   :  { %5601 = vmatprep.subr.bf16.mxu1 %v7902_v0 }
  0xcb   :  { %5576 = vmatpush3.bf16.xpose.msra.mxu0 %v6930_v56 }
  0xcc   :  { %5577 = vmatprep.subr.bf16.mxu0 %v7902_v0 }
  0xcf   :  { %5603 = vmatpush3.bf16.xpose.msra.mxu1 %v6932_v57 }
  0xd0   :  { %5628 = vmatprep.subr.bf16.mxu1 %v7902_v0 }
  0xd3   :  { %5579 = vmatpush3.bf16.xpose.msra.mxu0 %v6938_v60 }
  0xd4   :  { %5604 = vmatprep.subr.bf16.mxu0 %v7902_v0 }
 0x164   :  { %v6945_v7 = vpop.f32.mrb[0].mxu1 }
 0x165   :  { %v436_v8 = vrot.slane %v6945_v7, %v6943_v4  ;;  %v4204_v9 = vpop.f32.mrb[1].mxu1 }
 0x166   :  { %v169_v9 = vld [vmem:[#allocation5 + $0x1e8] sm:$0xff] }
 0x167   :  { %v444_v13 = vcombine.high %v436_v8, %v436_v8  ;;  %v6952_v14 = vrot.slane %v436_v8, %v6943_v4  ;;  %v168_v8 = vld [vmem:[#allocation5 + $0x1e0] sm:$0xff] }
 0x168   :  { %v6984_v40 = vpop.f32.mrb[0].mxu0  ;;  %v7015_v11 = vpack.c.bf16 %v169_v9, %v168_v8  ;;  %v7055_v8 = vpack.c.bf16 %v193_v5, %v192_v63  ;;  %v178_v9 = vld [vmem:[#allocation5 + $0x230] sm:$0xff]  ;;  %v184_v5 = vld [vmem:[#allocation5 + $0x260] sm:$0xff] }
 0x169   :  { %v6957_v17 = vrot.slane %v444_v13, %v6943_v4  ;;  %4238 = vmatmul.mubr.f32.vlgmr.msra.gmra.mrb[2].mxu0 %v6952_v14  ;;  %7939 = vst [vmem:[#allocation32_spill] sm:$0xff] %v6984_v40  ;;  %v6987_v43 = vpop.f32.mrb[1].mxu0  ;;  %v154_v13 = vld [vmem:[#allocation5 + $0x170] sm:$0xff]  ;;  %v474_v41 = vcombine.high %v6952_v14, %v6952_v14  ;;  %v225_v40 = vld [vmem:[#allocation5 + $0x3a8] sm:$0xff] }
 0x16a   :  { %5606 = vmatpush3.bf16.xpose.msra.mxu0 %v6949_v12  ;;  %4307 = vmatprep.mubr.msk.f32.mxu0 %vm6732_vm0, %v7870_v1  ;;  %7940 = vst [vmem:[#allocation33_spill] sm:$0xff] %v6987_v43  ;;  %v7021_v23 = vpack.c.bf16 %v155_v18, %v154_v13  ;;  %v190_v14 = vld [vmem:[#allocation5 + $0x290] sm:$0xff]  ;;  %v179_v13 = vld [vmem:[#allocation5 + $0x238] sm:$0xff]  ;;  %v209_v43 = vld [vmem:[#allocation5 + $0x328] sm:$0xff] }
 0x16b   :  { %4273 = vmatmul.mubr.f32.vlgmr.msra.gmra.mrb[2].mxu1 %v6957_v17  ;;  %5607 = vmatprep.subr.bf16.mxu0 %v7902_v0  ;;  %v476_v48 = vcombine.high %v6957_v17, %v6957_v17  ;;  %v7045_v17 = vpack.c.bf16 %v175_v52, %v174_v49  ;;  %v7047_v58 = vpack.c.bf16 %v191_v53, %v190_v14  ;;  %v194_v18 = vld [vmem:[#allocation5 + $0x2b0] sm:$0xff]  ;;  %v183_v14 = vld [vmem:[#allocation5 + $0x258] sm:$0xff] }
 0x16c   :  { %5630 = vmatpush3.bf16.xpose.msra.mxu1 %v6954_v16  ;;  %4342 = vmatprep.mubr.msk.f32.mxu1 %vm6732_vm0, %v7870_v1  ;;  %v7061_v22 = vpack.c.bf16 %v179_v13, %v178_v9  ;;  %v7063_v29 = vpack.c.bf16 %v195_v19, %v194_v18  ;;  %v182_v52 = vld [vmem:[#allocation5 + $0x250] sm:$0xff]  ;;  %v185_v9 = vld [vmem:[#allocation5 + $0x268] sm:$0xff]  ;;  %v200_v13 = vld [vmem:[#allocation5 + $0x2e0] sm:$0xff] }
 0x16d   :  { %5631 = vmatprep.subr.bf16.mxu1 %v7902_v0  ;;  %v198_v53 = vld [vmem:[#allocation5 + $0x2d0] sm:$0xff]  ;;  %v7077_v62 = vpack.c.bf16 %v183_v14, %v182_v52  ;;  %v201_v18 = vld [vmem:[#allocation5 + $0x2e8] sm:$0xff]  ;;  %v7085_v19 = vpack.c.bf16 %v185_v9, %v184_v5  ;;  %v203_v14 = vld [vmem:[#allocation5 + $0x2f8] sm:$0xff] }
 0x16e   :  { %v7079_v63 = vpack.c.bf16 %v199_v59, %v198_v53  ;;  %v202_v52 = vld [vmem:[#allocation5 + $0x2f0] sm:$0xff]  ;;  %v204_v9 = vld [vmem:[#allocation5 + $0x300] sm:$0xff] }
 0x16f   :  { %v7097_v59 = vpack.c.bf16 %v203_v14, %v202_v52  ;;  %v7943_v52 = vmov 0.0   ;;  %v206_v14 = vld [vmem:[#allocation5 + $0x310] sm:$0xff] }
 0x172   :  { %5609 = vmatpush3.bf16.xpose.msra.mxu0 %v6969_v24 }
 0x173   :  { %5610 = vmatprep.subr.bf16.mxu0 %v7902_v0 }
 0x174   :  { %5633 = vmatpush3.bf16.xpose.msra.mxu1 %v6971_v25 }
 0x175   :  { %5634 = vmatprep.subr.bf16.mxu1 %v7902_v0 }
 0x17a   :  { %5612 = vmatpush3.bf16.xpose.msra.mxu0 %v6977_v34 }
 0x17b   :  { %5613 = vmatprep.subr.bf16.mxu0 %v7902_v0 }
 0x17c   :  { %5636 = vmatpush3.bf16.xpose.msra.mxu1 %v6979_v35 }
 0x17d   :  { %5637 = vmatprep.subr.bf16.mxu1 %v7902_v0 }
 0x182   :  { %5615 = vmatpush3.bf16.xpose.msra.mxu0 %v6989_v46 }
 0x183   :  { %5616 = vmatprep.subr.bf16.mxu0 %v7902_v0 }
 0x184   :  { %5639 = vmatpush3.bf16.xpose.msra.mxu1 %v6991_v47 }
 0x185   :  { %5640 = vmatprep.subr.bf16.mxu1 %v7902_v0 }
 0x18a   :  { %5618 = vmatpush3.bf16.xpose.msra.mxu0 %v6997_v54 }
 0x18b   :  { %5619 = vmatprep.subr.bf16.mxu0 %v7902_v0 }
 0x18c   :  { %5642 = vmatpush3.bf16.xpose.msra.mxu1 %v6999_v55 }
 0x18d   :  { %5643 = vmatprep.subr.bf16.mxu1 %v7902_v0 }
 0x192   :  { %5621 = vmatpush3.bf16.xpose.msra.mxu0 %v7005_v2 }
 0x193   :  { %5622 = vmatprep.subr.bf16.mxu0 %v7902_v0 }
 0x194   :  { %5645 = vmatpush3.bf16.xpose.msra.mxu1 %v7007_v3 }
 0x195   :  { %5646 = vmatprep.subr.bf16.mxu1 %v7902_v0 }
 0x19a   :  { %5624 = vmatpush3.bf16.xpose.msra.mxu0 %v7013_v10 }
 0x19b   :  { %5625 = vmatprep.subr.bf16.mxu0 %v7902_v0 }
 0x19c   :  { %5648 = vmatpush3.bf16.xpose.msra.mxu1 %v7015_v11 }
 0x19d   :  { %5649 = vmatprep.subr.bf16.mxu1 %v7902_v0 }
 0x1a2   :  { %5627 = vmatpush3.bf16.xpose.msra.mxu0 %v7021_v23 }
 0x1a3   :  { %5652 = vmatprep.subr.bf16.mxu0 %v7902_v0 }
 0x1a4   :  { %5651 = vmatpush3.bf16.xpose.msra.mxu1 %v7023_v28 }
 0x1a5   :  { %5676 = vmatprep.subr.bf16.mxu1 %v7902_v0 }
 0x1a9   :  { %4308 = vmatmul.mubr.f32.vlgmr.msra.gmra.mrb[4].mxu0 %v474_v41  ;;  %v197_v41 = vld [vmem:[#allocation5 + $0x2c8] sm:$0xff] }
 0x1aa   :  { %5654 = vmatpush3.bf16.xpose.msra.mxu0 %v7029_v37  ;;  %4377 = vmatprep.mubr.msk.f32.mxu0 %vm6732_vm0, %v7870_v1  ;;  %v7071_v49 = vpack.c.bf16 %v197_v41, %v196_v36  ;;  %v187_v36 = vld [vmem:[#allocation5 + $0x278] sm:$0xff]  ;;  %v429_v41 = vcombine.high %v6945_v7, %v6945_v7  ;;  %v220_v7 = vld [vmem:[#allocation5 + $0x380] sm:$0xff] }
 0x1ab   :  { %4343 = vmatmul.mubr.f32.vlgmr.msra.gmra.mrb[4].mxu1 %v476_v48  ;;  %5655 = vmatprep.subr.bf16.mxu0 %v7902_v0  ;;  %v7069_v48 = vpack.c.bf16 %v181_v31, %v180_v30  ;;  %v7087_v30 = vpack.c.bf16 %v201_v18, %v200_v13  ;;  %v186_v31 = vld [vmem:[#allocation5 + $0x270] sm:$0xff]  ;;  %v205_v13 = vld [vmem:[#allocation5 + $0x308] sm:$0xff] }
 0x1ac   :  { %5678 = vmatpush3.bf16.xpose.msra.mxu1 %v7033_v42  ;;  %4412 = vmatprep.mubr.msk.f32.mxu1 %vm6732_vm0, %v7870_v1  ;;  %v7095_v53 = vpack.c.bf16 %v187_v36, %v186_v31  ;;  %v443_v5 = vrot.slane %v429_v41, %v6943_v4  ;;  %v7104_v1 = vpack.c.bf16 %v205_v13, %v204_v9  ;;  %v207_v9 = vld [vmem:[#allocation5 + $0x318] sm:$0xff] }
 0x1ad   :  { %5679 = vmatprep.subr.bf16.mxu1 %v7902_v0  ;;  %v7109_v36 = vpack.c.bf16 %v221_v61, %v220_v7  ;;  %v222_v61 = vld [vmem:[#allocation5 + $0x390] sm:$0xff]  ;;  %v7124_v13 = vpack.c.bf16 %v207_v9, %v206_v14  ;;  %v208_v7 = vld [vmem:[#allocation5 + $0x320] sm:$0xff]  ;;  %v211_v9 = vld [vmem:[#allocation5 + $0x338] sm:$0xff] }
 0x1ae   :  { %v445_v18 = vcombine.high %v443_v5, %v443_v5  ;;  %7941 = vst [vmem:[#allocation34_spill] sm:$0xff] %v7104_v1  ;;  %v7107_v31 = vrot.slane %v443_v5, %v6943_v4  ;;  %v223_v5 = vld [vmem:[#allocation5 + $0x398] sm:$0xff]  ;;  %v210_v14 = vld [vmem:[#allocation5 + $0x330] sm:$0xff] }
 0x1af   :  { %7942 = vst [vmem:[#allocation35_spill] sm:$0xff] %v7109_v36  ;;  %7944 = vst [vmem:[#allocation36_spill] sm:$0xff] %v7124_v13 }
 0x1b0   :  { %v7113_v41 = vrot.slane %v445_v18, %v6943_v4  ;;  %v7126_v18 = vpack.c.bf16 %v223_v5, %v222_v61  ;;  %v224_v4 = vld [vmem:[#allocation5 + $0x3a0] sm:$0xff]  ;;  %v226_v61 = vld [vmem:[#allocation5 + $0x3b0] sm:$0xff]  ;;  %v227_v5 = vld [vmem:[#allocation5 + $0x3b8] sm:$0xff] }
 0x1b2   :  { %5657 = vmatpush3.bf16.xpose.msra.mxu0 %v7045_v17  ;;  %7945 = vst [vmem:[#allocation37_spill] sm:$0xff] %v7126_v18 }
 0x1b3   :  { %5658 = vmatprep.subr.bf16.mxu0 %v7902_v0 }
 0x1b4   :  { %5681 = vmatpush3.bf16.xpose.msra.mxu1 %v7047_v58 }
 0x1b5   :  { %5682 = vmatprep.subr.bf16.mxu1 %v7902_v0 }
 0x1ba   :  { %5660 = vmatpush3.bf16.xpose.msra.mxu0 %v7053_v6 }
 0x1bb   :  { %5661 = vmatprep.subr.bf16.mxu0 %v7902_v0 }
 0x1bc   :  { %5684 = vmatpush3.bf16.xpose.msra.mxu1 %v7055_v8 }
 0x1bd   :  { %5685 = vmatprep.subr.bf16.mxu1 %v7902_v0 }
 0x1c2   :  { %5663 = vmatpush3.bf16.xpose.msra.mxu0 %v7061_v22 }
 0x1c3   :  { %5664 = vmatprep.subr.bf16.mxu0 %v7902_v0 }
 0x1c4   :  { %5687 = vmatpush3.bf16.xpose.msra.mxu1 %v7063_v29 }
 0x1c5   :  { %5688 = vmatprep.subr.bf16.mxu1 %v7902_v0 }
 0x1ca   :  { %5666 = vmatpush3.bf16.xpose.msra.mxu0 %v7069_v48 }
 0x1cb   :  { %5667 = vmatprep.subr.bf16.mxu0 %v7902_v0 }
 0x1cc   :  { %5690 = vmatpush3.bf16.xpose.msra.mxu1 %v7071_v49 }
 0x1cd   :  { %5691 = vmatprep.subr.bf16.mxu1 %v7902_v0 }
 0x1d2   :  { %5669 = vmatpush3.bf16.xpose.msra.mxu0 %v7077_v62 }
 0x1d3   :  { %5670 = vmatprep.subr.bf16.mxu0 %v7902_v0 }
 0x1d4   :  { %5693 = vmatpush3.bf16.xpose.msra.mxu1 %v7079_v63 }
 0x1d5   :  { %5694 = vmatprep.subr.bf16.mxu1 %v7902_v0 }
 0x1da   :  { %5672 = vmatpush3.bf16.xpose.msra.mxu0 %v7085_v19 }
 0x1db   :  { %5673 = vmatprep.subr.bf16.mxu0 %v7902_v0 }
 0x1dc   :  { %5696 = vmatpush3.bf16.xpose.msra.mxu1 %v7087_v30 }
 0x1dd   :  { %5697 = vmatprep.subr.bf16.mxu1 %v7902_v0 }
 0x1e2   :  { %5675 = vmatpush3.bf16.xpose.msra.mxu0 %v7095_v53 }
 0x1e3   :  { %5700 = vmatprep.subr.bf16.mxu0 %v7902_v0 }
 0x1e4   :  { %5699 = vmatpush3.bf16.xpose.msra.mxu1 %v7097_v59 }
 0x1e5   :  { %5724 = vmatprep.subr.bf16.mxu1 %v7902_v0 }
 0x1e9   :  { %4378 = vmatmul.mubr.f32.vlgmr.msra.gmra.mrb[6].mxu0 %v7107_v31 }
 0x1ea   :  { %5702 = vmatpush3.bf16.xpose.msra.mxu0 %v7104_v1  ;;  %4447 = vmatprep.mubr.msk.f32.mxu0 %vm6732_vm0, %v7943_v52  ;;  %v7134_v1 = vpack.c.bf16 %v225_v40, %v224_v4  ;;  %v212_v4 = vld [vmem:[#allocation5 + $0x340] sm:$0xff]  ;;  %v213_v40 = vld [vmem:[#allocation5 + $0x348] sm:$0xff] }
 0x1eb   :  { %4413 = vmatmul.mubr.f32.vlgmr.msra.gmra.mrb[6].mxu1 %v7113_v41  ;;  %5703 = vmatprep.subr.bf16.mxu0 %v7902_v0 }
 0x1ec   :  { %5726 = vmatpush3.bf16.xpose.msra.mxu1 %v7109_v36  ;;  %4482 = vmatprep.mubr.msk.f32.mxu1 %vm6732_vm0, %v7943_v52  ;;  %v7132_v36 = vpack.c.bf16 %v209_v43, %v208_v7  ;;  %7947 = vst [vmem:[#allocation39_spill] sm:$0xff] %v7134_v1  ;;  %v228_v43 = vld [vmem:[#allocation5 + $0x3c0] sm:$0xff]  ;;  %v229_v7 = vld [vmem:[#allocation5 + $0x3c8] sm:$0xff] }
 0x1ed   :  { %5727 = vmatprep.subr.bf16.mxu1 %v7902_v0 }
 0x1ee   :  { %7946 = vst [vmem:[#allocation38_spill] sm:$0xff] %v7132_v36 }
 0x1f2   :  { %5705 = vmatpush3.bf16.xpose.msra.mxu0 %v7124_v13  ;;  %v7142_v13 = vpack.c.bf16 %v227_v5, %v226_v61  ;;  %v230_v61 = vld [vmem:[#allocation5 + $0x3d0] sm:$0xff]  ;;  %v231_v5 = vld [vmem:[#allocation5 + $0x3d8] sm:$0xff] }
 0x1f3   :  { %5706 = vmatprep.subr.bf16.mxu0 %v7902_v0 }
 0x1f4   :  { %5729 = vmatpush3.bf16.xpose.msra.mxu1 %v7126_v18  ;;  %v7140_v18 = vpack.c.bf16 %v211_v9, %v210_v14  ;;  %7949 = vst [vmem:[#allocation41_spill] sm:$0xff] %v7142_v13  ;;  %v214_v14 = vld [vmem:[#allocation5 + $0x350] sm:$0xff]  ;;  %v215_v9 = vld [vmem:[#allocation5 + $0x358] sm:$0xff] }
 0x1f5   :  { %5730 = vmatprep.subr.bf16.mxu1 %v7902_v0 }
 0x1f6   :  { %7948 = vst [vmem:[#allocation40_spill] sm:$0xff] %v7140_v18 }
 0x1fa   :  { %5708 = vmatpush3.bf16.xpose.msra.mxu0 %v7132_v36  ;;  %v7150_v36 = vpack.c.bf16 %v229_v7, %v228_v43  ;;  %v232_v43 = vld [vmem:[#allocation5 + $0x3e0] sm:$0xff]  ;;  %v233_v7 = vld [vmem:[#allocation5 + $0x3e8] sm:$0xff] }
 0x1fb   :  { %5709 = vmatprep.subr.bf16.mxu0 %v7902_v0 }
 0x1fc   :  { %5732 = vmatpush3.bf16.xpose.msra.mxu1 %v7134_v1  ;;  %v7148_v1 = vpack.c.bf16 %v213_v40, %v212_v4  ;;  %7951 = vst [vmem:[#allocation43_spill] sm:$0xff] %v7150_v36  ;;  %v216_v4 = vld [vmem:[#allocation5 + $0x360] sm:$0xff]  ;;  %v217_v40 = vld [vmem:[#allocation5 + $0x368] sm:$0xff] }
 0x1fd   :  { %5733 = vmatprep.subr.bf16.mxu1 %v7902_v0 }
 0x1fe   :  { %7950 = vst [vmem:[#allocation42_spill] sm:$0xff] %v7148_v1 }
 0x202   :  { %5711 = vmatpush3.bf16.xpose.msra.mxu0 %v7140_v18  ;;  %v7158_v18 = vpack.c.bf16 %v231_v5, %v230_v61  ;;  %v234_v61 = vld [vmem:[#allocation5 + $0x3f0] sm:$0xff]  ;;  %v235_v5 = vld [vmem:[#allocation5 + $0x3f8] sm:$0xff] }
 0x203   :  { %5712 = vmatprep.subr.bf16.mxu0 %v7902_v0 }
 0x204   :  { %5735 = vmatpush3.bf16.xpose.msra.mxu1 %v7142_v13  ;;  %v7156_v13 = vpack.c.bf16 %v215_v9, %v214_v14  ;;  %7953 = vst [vmem:[#allocation45_spill] sm:$0xff] %v7158_v18  ;;  %v218_v14 = vld [vmem:[#allocation5 + $0x370] sm:$0xff]  ;;  %v219_v9 = vld [vmem:[#allocation5 + $0x378] sm:$0xff] }
 0x205   :  { %5736 = vmatprep.subr.bf16.mxu1 %v7902_v0 }
 0x206   :  { %7952 = vst [vmem:[#allocation44_spill] sm:$0xff] %v7156_v13 }
 0x20a   :  { %5714 = vmatpush3.bf16.xpose.msra.mxu0 %v7148_v1  ;;  %v7166_v1 = vpack.c.bf16 %v233_v7, %v232_v43 }
 0x20b   :  { %5715 = vmatprep.subr.bf16.mxu0 %v7902_v0 }
 0x20c   :  { %5738 = vmatpush3.bf16.xpose.msra.mxu1 %v7150_v36  ;;  %v7164_v36 = vpack.c.bf16 %v217_v40, %v216_v4  ;;  %7955 = vst [vmem:[#allocation47_spill] sm:$0xff] %v7166_v1  ;;  %v475_v4 = vcombine.high %v7107_v31, %v7107_v31  ;;  %v477_v40 = vcombine.high %v7113_v41, %v7113_v41  ;;  %v7958_v31 = vlaneseq }
 0x20d   :  { %5739 = vmatprep.subr.bf16.mxu1 %v7902_v0 }
 0x20e   :  { %7954 = vst [vmem:[#allocation46_spill] sm:$0xff] %v7164_v36  ;;  %v7201_v41 = vand.u32 127, %v7958_v31 }
 0x210   :  { %7959 = vst [vmem:[#allocation50_spill] sm:$0xff] %v7201_v41  ;;  %vm238_vm1 = vcmp.lt.s32.totalorder %v7201_v41, 8 }
 0x212   :  { %5717 = vmatpush3.bf16.xpose.msra.mxu0 %v7156_v13  ;;  %v7174_v13 = vpack.c.bf16 %v235_v5, %v234_v61 }
 0x213   :  { %5718 = vmatprep.subr.bf16.mxu0 %v7902_v0 }
 0x214   :  { %5741 = vmatpush3.bf16.xpose.msra.mxu1 %v7158_v18  ;;  %v7172_v18 = vpack.c.bf16 %v219_v9, %v218_v14  ;;  %7957 = vst [vmem:[#allocation49_spill] sm:$0xff] %v7174_v13 }
 0x215   :  { %5742 = vmatprep.subr.bf16.mxu1 %v7902_v0 }
 0x216   :  { %7956 = vst [vmem:[#allocation48_spill] sm:$0xff] %v7172_v18 }
 0x21a   :  { %5720 = vmatpush3.bf16.xpose.msra.mxu0 %v7164_v36 }
 0x21b   :  { %5721 = vmatprep.subr.bf16.mxu0 %v7902_v0 }
 0x21c   :  { %5744 = vmatpush3.bf16.xpose.msra.mxu1 %v7166_v1 }
 0x21d   :  { %5745 = vmatprep.subr.bf16.mxu1 %v7902_v0 }
 0x222   :  { %5723 = vmatpush3.bf16.xpose.msra.mxu0 %v7172_v18 }
 0x223   :  { %5748 = vmatprep.subr.bf16.mxu0 %v7902_v0 }
 0x224   :  { %5747 = vmatpush3.bf16.xpose.msra.mxu1 %v7174_v13 }
 0x225   :  { %5772 = vmatprep.subr.bf16.mxu1 %v7902_v0 }
 0x229   :  { %4448 = vmatmul.mubr.f32.vlgmr.msra.gmra.mrb[8].mxu0 %v475_v4 }
 0x22a   :  { %5750 = vmatpush3.bf16.msra.mxu0 %v6882_v20  ;;  %4517 = vmatprep.mubr.msk.f32.mxu0 %vm6732_vm0, %v7943_v52 }
 0x22b   :  { %4483 = vmatmul.mubr.f32.vlgmr.msra.gmra.mrb[8].mxu1 %v477_v40  ;;  %5751 = vmatprep.subr.bf16.mxu0 %v7902_v0 }
 0x22c   :  { %5774 = vmatpush3.bf16.msra.mxu1 %v6875_v15  ;;  %4552 = vmatprep.mubr.msk.f32.mxu1 %vm6732_vm0, %v7943_v52 }
 0x22d   :  { %5775 = vmatprep.subr.bf16.mxu1 %v7902_v0 }
 0x22e   :  { %5753 = vmatpush3.bf16.msra.mxu0 %v6890_v26 }
 0x22f   :  { %5754 = vmatprep.subr.bf16.mxu0 %v7902_v0 }
 0x230   :  { %5777 = vmatpush3.bf16.msra.mxu1 %v6884_v21 }
 0x231   :  { %5778 = vmatprep.subr.bf16.mxu1 %v7902_v0 }
 0x232   :  { %5756 = vmatpush3.bf16.msra.mxu0 %v6898_v32 }
 0x233   :  { %5757 = vmatprep.subr.bf16.mxu0 %v7902_v0 }
 0x234   :  { %5780 = vmatpush3.bf16.msra.mxu1 %v6892_v27 }
 0x235   :  { %5781 = vmatprep.subr.bf16.mxu1 %v7902_v0 }
 0x236   :  { %5759 = vmatpush3.bf16.msra.mxu0 %v6906_v38 }
 0x237   :  { %5760 = vmatprep.subr.bf16.mxu0 %v7902_v0 }
 0x238   :  { %5783 = vmatpush3.bf16.msra.mxu1 %v6900_v33 }
 0x239   :  { %5784 = vmatprep.subr.bf16.mxu1 %v7902_v0 }
 0x23a   :  { %5762 = vmatpush3.bf16.msra.mxu0 %v6914_v44 }
 0x23b   :  { %5763 = vmatprep.subr.bf16.mxu0 %v7902_v0 }
 0x23c   :  { %v552_v43 = vpop.f32.mrb[2].mxu0  ;;  %5786 = vmatpush3.bf16.msra.mxu1 %v6908_v39 }
 0x23d   :  { %v1046_v7 = vsel %vm238_vm1, %v552_v43, -1e+30  ;;  %v4239_v14 = vpop.f32.mrb[3].mxu0  ;;  %5787 = vmatprep.subr.bf16.mxu1 %v7902_v0 }
 0x23e   :  { %v622_v9 = vpop.f32.mrb[2].mxu1  ;;  %v1055_v61 = vsel %vm1054_vm2, %v1046_v7, -inf  ;;  %5765 = vmatpush3.bf16.msra.mxu0 %v6922_v50 }
 0x23f   :  { %v1047_v5 = vsel %vm238_vm1, %v622_v9, -1e+30  ;;  %v4274_v4 = vpop.f32.mrb[3].mxu1  ;;  %1056 = vmax.xlane.f32.xlu0 %v1055_v61  ;;  %5766 = vmatprep.subr.bf16.mxu0 %v7902_v0 }
 0x240   :  { %5789 = vmatpush3.bf16.msra.mxu1 %v6916_v45  ;;  %v1058_v40 = vsel %vm1054_vm2, %v1047_v5, -inf }
 0x241   :  { %5790 = vmatprep.subr.bf16.mxu1 %v7902_v0 }
 0x242   :  { %5768 = vmatpush3.bf16.msra.mxu0 %v6930_v56 }
 0x243   :  { %1059 = vmax.xlane.f32.xlu0 %v1058_v40  ;;  %5769 = vmatprep.subr.bf16.mxu0 %v7902_v0 }
 0x244   :  { %5792 = vmatpush3.bf16.msra.mxu1 %v6924_v51 }
 0x245   :  { %5793 = vmatprep.subr.bf16.mxu1 %v7902_v0 }
 0x246   :  { %5771 = vmatpush3.bf16.msra.mxu0 %v6938_v60 }
 0x247   :  { %5796 = vmatprep.subr.bf16.mxu0 %v7902_v0 }
 0x248   :  { %5795 = vmatpush3.bf16.msra.mxu1 %v6932_v57 }
 0x249   :  { %5820 = vmatprep.subr.bf16.mxu1 %v7902_v0 }
 0x27c   :  { %v692_v31 = vpop.f32.mrb[4].mxu0 }
 0x27d   :  { %v1048_v43 = vsel %vm238_vm1, %v692_v31, -1e+30  ;;  %v4309_v14 = vpop.f32.mrb[5].mxu0 }
 0x27e   :  { %v762_v9 = vpop.f32.mrb[4].mxu1  ;;  %v1061_v61 = vsel %vm1054_vm2, %v1048_v43, -inf }
 0x27f   :  { %v1049_v4 = vsel %vm238_vm1, %v762_v9, -1e+30  ;;  %v4344_v40 = vpop.f32.mrb[5].mxu1  ;;  %1062 = vmax.xlane.f32.xlu1 %v1061_v61 }
 0x280   :  { %v1064_v60 = vsel %vm1054_vm2, %v1049_v4, -inf }
 0x283   :  { %1065 = vmax.xlane.f32.xlu1 %v1064_v60 }
 0x2bc   :  { %v832_v56 = vpop.f32.mrb[6].mxu0 }
 0x2bd   :  { %v1050_v0 = vsel %vm238_vm1, %v832_v56, -1e+30  ;;  %v4379_v50 = vpop.f32.mrb[7].mxu0 }
 0x2be   :  { %v902_v44 = vpop.f32.mrb[6].mxu1  ;;  %v1067_v31 = vsel %vm1054_vm2, %v1050_v0, -inf }
 0x2bf   :  { %v1051_v14 = vsel %vm238_vm1, %v902_v44, -1e+30  ;;  %v4414_v38 = vpop.f32.mrb[7].mxu1  ;;  %1068 = vmax.xlane.f32.xlu0 %v1067_v31 }
 0x2c0   :  { %v1070_v9 = vsel %vm1054_vm2, %v1051_v14, -inf }
 0x2c1   :  { %1071 = vmax.xlane.f32.xlu1 %v1070_v9 }
 0x2cc   :  { %v1057_v61 = vpop.xlane.xlu0 %1056 }
 0x2cd   :  { %v1079_v40 = vsub.f32 %v1046_v7, %v1057_v61 }
 0x2cf   :  { %v1087_v32 = vmul.f32 1.442695, %v1079_v40 }
 0x2d0   :  { %v1060_v60 = vpop.xlane.xlu0 %1059 }
 0x2d1   :  { %6464 = vpow2.f32 %v1087_v32  ;;  %v1080_v26 = vsub.f32 %v1047_v5, %v1060_v60 }
 0x2d3   :  { %v1089_v20 = vmul.f32 1.442695, %v1080_v26 }
 0x2d5   :  { %6466 = vpow2.f32 %v1089_v20 }
 0x2db   :  { %v6465_v50 = vpop.eup %6464 }
 0x2dc   :  { %v1103_v56 = vsel %vm1054_vm2, %v6465_v50, 0.0 }
 0x2dd   :  { %1104 = vadd.xlane.f32.xlu0 %v1103_v56 }
 0x2df   :  { %v6467_v57 = vpop.eup %6466 }
 0x2e0   :  { %v1106_v44 = vsel %vm1054_vm2, %v6467_v57, 0.0 }
 0x2e1   :  { %1107 = vadd.xlane.f32.xlu1 %v1106_v44 }
 0x2fc   :  { %v972_v38 = vpop.f32.mrb[8].mxu0 }
 0x2fd   :  { %v7246_v31 = vsel %vm238_vm1, %v972_v38, -1e+30  ;;  %v4449_v7 = vpop.f32.mrb[9].mxu0 }
 0x2fe   :  { %v1042_v9 = vpop.f32.mrb[8].mxu1  ;;  %v1073_v32 = vsel %vm1054_vm2, %v7246_v31, -inf }
 0x2ff   :  { %v7252_v20 = vsel %vm238_vm1, %v1042_v9, -1e+30  ;;  %v4484_v26 = vpop.f32.mrb[9].mxu1  ;;  %1074 = vmax.xlane.f32.xlu0 %v1073_v32 }
 0x300   :  { %v1076_v5 = vsel %vm1054_vm2, %v7252_v20, -inf }
 0x301   :  { %1077 = vmax.xlane.f32.xlu1 %v1076_v5 }
 0x30c   :  { %v1063_v61 = vpop.xlane.xlu1 %1062 }
 0x30d   :  { %v1081_v40 = vsub.f32 %v1048_v43, %v1063_v61 }
 0x30f   :  { %v1091_v60 = vmul.f32 1.442695, %v1081_v40 }
 0x310   :  { %v1066_v56 = vpop.xlane.xlu1 %1065 }
 0x311   :  { %6468 = vpow2.f32 %v1091_v60  ;;  %v1082_v44 = vsub.f32 %v1049_v4, %v1066_v56 }
 0x313   :  { %v1093_v38 = vmul.f32 1.442695, %v1082_v44 }
 0x315   :  { %6470 = vpow2.f32 %v1093_v38 }
 0x31b   :  { %v7256_v7 = vpop.eup %6468 }
 0x31c   :  { %v1109_v9 = vsel %vm1054_vm2, %v7256_v7, 0.0 }
 0x31d   :  { %1110 = vadd.xlane.f32.xlu0 %v1109_v9 }
 0x31f   :  { %v7260_v26 = vpop.eup %6470 }
 0x320   :  { %v1112_v32 = vsel %vm1054_vm2, %v7260_v26, 0.0 }
 0x321   :  { %1113 = vadd.xlane.f32.xlu1 %v1112_v32 }
 0x34c   :  { %v1069_v5 = vpop.xlane.xlu0 %1068 }
 0x34d   :  { %v1083_v43 = vsub.f32 %v1050_v0, %v1069_v5 }
 0x34e   :  { %v1072_v61 = vpop.xlane.xlu1 %1071 }
 0x34f   :  { %v1095_v40 = vmul.f32 1.442695, %v1083_v43  ;;  %v1084_v60 = vsub.f32 %v1051_v14, %v1072_v61 }
 0x351   :  { %6472 = vpow2.f32 %v1095_v40  ;;  %v1097_v4 = vmul.f32 1.442695, %v1084_v60  ;;  %v7960_v40 = vmov 0.0|0.0  }
 0x353   :  { %6474 = vpow2.f32 %v1097_v4 }
 0x35b   :  { %v7264_v56 = vpop.eup %6472 }
 0x35c   :  { %v1115_v44 = vsel %vm1054_vm2, %v7264_v56, 0.0 }
 0x35d   :  { %v7268_v38 = vpop.eup %6474  ;;  %1116 = vadd.xlane.f32.xlu0 %v1115_v44 }
 0x35e   :  { %v1118_v9 = vsel %vm1054_vm2, %v7268_v38, 0.0 }
 0x35f   :  { %1119 = vadd.xlane.f32.xlu1 %v1118_v9 }
 0x36a   :  { %v1105_v32 = vpop.xlane.xlu0 %1104 }
 0x36b   :  { %6476 = vrcp.f32 %v1105_v32 }
 0x36e   :  { %v1108_v0 = vpop.xlane.xlu1 %1107 }
 0x36f   :  { %6478 = vrcp.f32 %v1108_v0 }
 0x375   :  { %v6477_v14 = vpop.eup %6476 }
 0x376   :  { %v1135_v5 = vmul.f32 %v6477_v14, %v6465_v50 }
 0x378   :  { %4518 = vmatmul.mubr.f32.vlgmr.msra.gmra.mrb[10].mxu0 %v1135_v5 }
 0x379   :  { %v6479_v43 = vpop.eup %6478  ;;  %5798 = vmatpush3.bf16.msra.mxu0 %v6949_v12  ;;  %4587 = vmatprep.mubr.msk.f32.mxu0 %vm6732_vm0, %v7943_v52 }
 0x37a   :  { %v1136_v61 = vmul.f32 %v6479_v43, %v6467_v57  ;;  %5799 = vmatprep.subr.bf16.mxu0 %v7960_v40 }
 0x37c   :  { %4553 = vmatmul.mubr.f32.vlgmr.msra.gmra.mrb[10].mxu1 %v1136_v61 }
 0x37d   :  { %5801 = vmatpush3.bf16.msra.mxu0 %v6969_v24  ;;  %5822 = vmatpush3.bf16.msra.mxu1 %v6954_v16 }
 0x37e   :  { %5802 = vmatprep.subr.bf16.mxu0 %v7960_v40  ;;  %5823 = vmatprep.subr.bf16.mxu1 %v7960_v40 }
 0x37f   :  { %4622 = vmatprep.mubr.msk.f32.mxu1 %vm6732_vm0, %v7943_v52 }
 0x381   :  { %5804 = vmatpush3.bf16.msra.mxu0 %v6977_v34  ;;  %5825 = vmatpush3.bf16.msra.mxu1 %v6971_v25 }
 0x382   :  { %5805 = vmatprep.subr.bf16.mxu0 %v7960_v40  ;;  %5826 = vmatprep.subr.bf16.mxu1 %v7960_v40 }
 0x385   :  { %5807 = vmatpush3.bf16.msra.mxu0 %v6989_v46  ;;  %5828 = vmatpush3.bf16.msra.mxu1 %v6979_v35 }
 0x386   :  { %5808 = vmatprep.subr.bf16.mxu0 %v7960_v40  ;;  %5829 = vmatprep.subr.bf16.mxu1 %v7960_v40 }
 0x389   :  { %5810 = vmatpush3.bf16.msra.mxu0 %v6997_v54  ;;  %5831 = vmatpush3.bf16.msra.mxu1 %v6991_v47 }
 0x38a   :  { %5811 = vmatprep.subr.bf16.mxu0 %v7960_v40  ;;  %5832 = vmatprep.subr.bf16.mxu1 %v7960_v40 }
 0x38c   :  { %v1075_v57 = vpop.xlane.xlu0 %1074 }
 0x38d   :  { %v1085_v50 = vsub.f32 %v7246_v31, %v1075_v57  ;;  %5813 = vmatpush3.bf16.msra.mxu0 %v7005_v2  ;;  %5834 = vmatpush3.bf16.msra.mxu1 %v6999_v55 }
 0x38e   :  { %v1078_v60 = vpop.xlane.xlu1 %1077  ;;  %5814 = vmatprep.subr.bf16.mxu0 %v7960_v40  ;;  %5835 = vmatprep.subr.bf16.mxu1 %v7960_v40 }
 0x38f   :  { %v1099_v4 = vmul.f32 1.442695, %v1085_v50  ;;  %v1086_v44 = vsub.f32 %v7252_v20, %v1078_v60 }
 0x391   :  { %6480 = vpow2.f32 %v1099_v4  ;;  %v1101_v9 = vmul.f32 1.442695, %v1086_v44  ;;  %5816 = vmatpush3.bf16.msra.mxu0 %v7013_v10  ;;  %5837 = vmatpush3.bf16.msra.mxu1 %v7007_v3 }
 0x392   :  { %5817 = vmatprep.subr.bf16.mxu0 %v7960_v40  ;;  %5838 = vmatprep.subr.bf16.mxu1 %v7960_v40 }
 0x393   :  { %6482 = vpow2.f32 %v1101_v9 }
 0x395   :  { %5819 = vmatpush3.bf16.msra.mxu0 %v7021_v23  ;;  %5840 = vmatpush3.bf16.msra.mxu1 %v7015_v11 }
 0x396   :  { %5841 = vmatprep.subr.bf16.mxu1 %v7960_v40  ;;  %5844 = vmatprep.subr.bf16.mxu0 %v7960_v40 }
 0x399   :  { %5843 = vmatpush3.bf16.msra.mxu1 %v7023_v28 }
 0x39a   :  { %5868 = vmatprep.subr.bf16.mxu1 %v7960_v40 }
 0x39b   :  { %v7310_v31 = vpop.eup %6480 }
 0x39c   :  { %v1121_v20 = vsel %vm1054_vm2, %v7310_v31, 0.0 }
 0x39d   :  { %v7314_v32 = vpop.eup %6482  ;;  %1122 = vadd.xlane.f32.xlu0 %v1121_v20  ;;  %v7961_v20 = vld [vmem:[#allocation34_spill] sm:$0xff] }
 0x39e   :  { %v1124_v0 = vsel %vm1054_vm2, %v7314_v32, 0.0 }
 0x39f   :  { %1125 = vadd.xlane.f32.xlu1 %v1124_v0  ;;  %v7962_v0 = vld [vmem:[#allocation35_spill] sm:$0xff] }
 0x3aa   :  { %v1111_v14 = vpop.xlane.xlu0 %1110 }
 0x3ab   :  { %6484 = vrcp.f32 %v1111_v14  ;;  %v7965_v14 = vld [vmem:[#allocation38_spill] sm:$0xff] }
 0x3ae   :  { %v1114_v5 = vpop.xlane.xlu1 %1113 }
 0x3af   :  { %6486 = vrcp.f32 %v1114_v5  ;;  %v7966_v5 = vld [vmem:[#allocation39_spill] sm:$0xff] }
 0x3b5   :  { %v6485_v43 = vpop.eup %6484 }
 0x3b6   :  { %v1137_v61 = vmul.f32 %v6485_v43, %v7256_v7  ;;  %v7967_v43 = vld [vmem:[#allocation40_spill] sm:$0xff] }
 0x3b8   :  { %4588 = vmatmul.mubr.f32.vlgmr.msra.gmra.mrb[12].mxu0 %v1137_v61  ;;  %v7968_v61 = vld [vmem:[#allocation41_spill] sm:$0xff] }
 0x3b9   :  { %v6487_v57 = vpop.eup %6486  ;;  %5846 = vmatpush3.bf16.msra.mxu0 %v7029_v37  ;;  %4657 = vmatprep.mubr.msk.f32.mxu0 %vm6732_vm0, %v7943_v52 }
 0x3ba   :  { %v1138_v50 = vmul.f32 %v6487_v57, %v7260_v26  ;;  %5847 = vmatprep.subr.bf16.mxu0 %v7960_v40  ;;  %v7969_v57 = vld [vmem:[#allocation42_spill] sm:$0xff] }
 0x3bc   :  { %4623 = vmatmul.mubr.f32.vlgmr.msra.gmra.mrb[12].mxu1 %v1138_v50  ;;  %v7970_v50 = vld [vmem:[#allocation43_spill] sm:$0xff] }
 0x3bd   :  { %5870 = vmatpush3.bf16.msra.mxu1 %v7033_v42  ;;  %5849 = vmatpush3.bf16.msra.mxu0 %v7045_v17 }
 0x3be   :  { %5871 = vmatprep.subr.bf16.mxu1 %v7960_v40  ;;  %5850 = vmatprep.subr.bf16.mxu0 %v7960_v40 }
 0x3bf   :  { %4692 = vmatprep.mubr.msk.f32.mxu1 %vm6732_vm0, %v7943_v52 }
 0x3c1   :  { %5873 = vmatpush3.bf16.msra.mxu1 %v7047_v58  ;;  %5852 = vmatpush3.bf16.msra.mxu0 %v7053_v6 }
 0x3c2   :  { %5874 = vmatprep.subr.bf16.mxu1 %v7960_v40  ;;  %5853 = vmatprep.subr.bf16.mxu0 %v7960_v40 }
 0x3c5   :  { %5876 = vmatpush3.bf16.msra.mxu1 %v7055_v8  ;;  %5855 = vmatpush3.bf16.msra.mxu0 %v7061_v22 }
 0x3c6   :  { %5877 = vmatprep.subr.bf16.mxu1 %v7960_v40  ;;  %5856 = vmatprep.subr.bf16.mxu0 %v7960_v40 }
 0x3c9   :  { %5879 = vmatpush3.bf16.msra.mxu1 %v7063_v29  ;;  %5858 = vmatpush3.bf16.msra.mxu0 %v7069_v48 }
 0x3ca   :  { %5880 = vmatprep.subr.bf16.mxu1 %v7960_v40  ;;  %5859 = vmatprep.subr.bf16.mxu0 %v7960_v40 }
 0x3cd   :  { %5882 = vmatpush3.bf16.msra.mxu1 %v7071_v49  ;;  %5861 = vmatpush3.bf16.msra.mxu0 %v7077_v62 }
 0x3ce   :  { %5883 = vmatprep.subr.bf16.mxu1 %v7960_v40  ;;  %5862 = vmatprep.subr.bf16.mxu0 %v7960_v40 }
 0x3d1   :  { %5885 = vmatpush3.bf16.msra.mxu1 %v7079_v63  ;;  %5864 = vmatpush3.bf16.msra.mxu0 %v7085_v19 }
 0x3d2   :  { %5886 = vmatprep.subr.bf16.mxu1 %v7960_v40  ;;  %5865 = vmatprep.subr.bf16.mxu0 %v7960_v40 }
 0x3d5   :  { %5888 = vmatpush3.bf16.msra.mxu1 %v7087_v30  ;;  %5867 = vmatpush3.bf16.msra.mxu0 %v7095_v53 }
 0x3d6   :  { %5889 = vmatprep.subr.bf16.mxu1 %v7960_v40  ;;  %5892 = vmatprep.subr.bf16.mxu0 %v7960_v40 }
 0x3d9   :  { %5891 = vmatpush3.bf16.msra.mxu1 %v7097_v59 }
 0x3da   :  { %5916 = vmatprep.subr.bf16.mxu1 %v7960_v40 }
 0x3ea   :  { %v1117_v7 = vpop.xlane.xlu0 %1116 }
 0x3eb   :  { %6488 = vrcp.f32 %v1117_v7  ;;  %v7971_v7 = vld [vmem:[#allocation44_spill] sm:$0xff] }
 0x3ec   :  { %v1120_v26 = vpop.xlane.xlu1 %1119 }
 0x3ed   :  { %6490 = vrcp.f32 %v1120_v26  ;;  %v7972_v26 = vld [vmem:[#allocation45_spill] sm:$0xff] }
 0x3f5   :  { %v6489_v60 = vpop.eup %6488 }
 0x3f6   :  { %v1139_v4 = vmul.f32 %v6489_v60, %v7264_v56  ;;  %v7963_v56 = vld [vmem:[#allocation36_spill] sm:$0xff] }
 0x3f7   :  { %v6491_v44 = vpop.eup %6490 }
 0x3f8   :  { %4658 = vmatmul.mubr.f32.vlgmr.msra.gmra.mrb[14].mxu0 %v1139_v4  ;;  %v1140_v9 = vmul.f32 %v6491_v44, %v7268_v38  ;;  %v7964_v38 = vld [vmem:[#allocation37_spill] sm:$0xff] }
 0x3f9   :  { %5894 = vmatpush3.bf16.msra.mxu0 %v7961_v20  ;;  %4727 = vmatprep.mubr.msk.f32.mxu0 %vm6732_vm0, %v7943_v52 }
 0x3fa   :  { %4693 = vmatmul.mubr.f32.vlgmr.msra.gmra.mrb[14].mxu1 %v1140_v9  ;;  %5895 = vmatprep.subr.bf16.mxu0 %v7960_v40 }
 0x3fb   :  { %5918 = vmatpush3.bf16.msra.mxu1 %v7962_v0  ;;  %4762 = vmatprep.mubr.msk.f32.mxu1 %vm6732_vm0, %v7943_v52 }
 0x3fc   :  { %5919 = vmatprep.subr.bf16.mxu1 %v7960_v40 }
 0x3fd   :  { %5897 = vmatpush3.bf16.msra.mxu0 %v7963_v56 }
 0x3fe   :  { %5898 = vmatprep.subr.bf16.mxu0 %v7960_v40 }
 0x3ff   :  { %5921 = vmatpush3.bf16.msra.mxu1 %v7964_v38 }
 0x400   :  { %5922 = vmatprep.subr.bf16.mxu1 %v7960_v40 }
 0x401   :  { %5900 = vmatpush3.bf16.msra.mxu0 %v7965_v14 }
 0x402   :  { %5901 = vmatprep.subr.bf16.mxu0 %v7960_v40 }
 0x403   :  { %5924 = vmatpush3.bf16.msra.mxu1 %v7966_v5 }
 0x404   :  { %5925 = vmatprep.subr.bf16.mxu1 %v7960_v40 }
 0x405   :  { %5903 = vmatpush3.bf16.msra.mxu0 %v7967_v43  ;;  %v1911_v43 = vld [vmem:[#allocation7 + $0x98] sm:$0xff] }
 0x406   :  { %5904 = vmatprep.subr.bf16.mxu0 %v7960_v40 }
 0x407   :  { %5927 = vmatpush3.bf16.msra.mxu1 %v7968_v61  ;;  %v1726_v61 = vld [vmem:[#allocation10 + $0x38] sm:$0xff] }
 0x408   :  { %5928 = vmatprep.subr.bf16.mxu1 %v7960_v40 }
 0x409   :  { %5906 = vmatpush3.bf16.msra.mxu0 %v7969_v57  ;;  %v1725_v57 = vld [vmem:[#allocation10 + $0x30] sm:$0xff] }
 0x40a   :  { %5907 = vmatprep.subr.bf16.mxu0 %v7960_v40 }
 0x40b   :  { %5930 = vmatpush3.bf16.msra.mxu1 %v7970_v50  ;;  %v1724_v50 = vld [vmem:[#allocation10 + $0x28] sm:$0xff] }
 0x40c   :  { %5931 = vmatprep.subr.bf16.mxu1 %v7960_v40 }
 0x40d   :  { %5909 = vmatpush3.bf16.msra.mxu0 %v7971_v7 }
 0x40e   :  { %5910 = vmatprep.subr.bf16.mxu0 %v7960_v40 }
 0x40f   :  { %5933 = vmatpush3.bf16.msra.mxu1 %v7972_v26 }
 0x410   :  { %5934 = vmatprep.subr.bf16.mxu1 %v7960_v40 }
 0x411   :  { %5912 = vmatpush3.bf16.msra.mxu0 %v7164_v36 }
 0x412   :  { %5913 = vmatprep.subr.bf16.mxu0 %v7960_v40 }
 0x413   :  { %5936 = vmatpush3.bf16.msra.mxu1 %v7166_v1 }
 0x414   :  { %5937 = vmatprep.subr.bf16.mxu1 %v7960_v40 }
 0x415   :  { %5915 = vmatpush3.bf16.msra.mxu0 %v7172_v18 }
 0x416   :  { %5940 = vmatprep.subr.bf16.mxu0 %v7960_v40 }
 0x417   :  { %5939 = vmatpush3.bf16.msra.mxu1 %v7174_v13 }
 0x418   :  { %5988 = vmatprep.subr.bf16.mxu1 %v7960_v40 }
 0x42a   :  { %v1123_v60 = vpop.xlane.xlu0 %1122 }
 0x42b   :  { %6492 = vrcp.f32 %v1123_v60  ;;  %v1719_v60 = vld [vmem:[#allocation10] sm:$0xff] }
 0x42c   :  { %v1126_v4 = vpop.xlane.xlu1 %1125 }
 0x42d   :  { %6494 = vrcp.f32 %v1126_v4  ;;  %v1720_v4 = vld [vmem:[#allocation10 + $0x8] sm:$0xff] }
 0x435   :  { %v6493_v44 = vpop.eup %6492 }
 0x436   :  { %v1141_v9 = vmul.f32 %v6493_v44, %v7310_v31  ;;  %v5941_v31 = vpack.c.bf16 %v1720_v4, %v1719_v60  ;;  %v1721_v44 = vld [vmem:[#allocation10 + $0x10] sm:$0xff]  ;;  %v1728_v60 = vld [vmem:[#allocation10 + $0x48] sm:$0xff]  ;;  %v1730_v4 = vld [vmem:[#allocation10 + $0x58] sm:$0xff] }
 0x437   :  { %v6495_v41 = vpop.eup %6494 }
 0x438   :  { %4728 = vmatmul.mubr.f32.vlgmr.msra.gmra.mrb[16].mxu0 %v1141_v9  ;;  %v1142_v1 = vmul.f32 %v6495_v41, %v7314_v32  ;;  %v1722_v9 = vld [vmem:[#allocation10 + $0x18] sm:$0xff] }
 0x439   :  { %4797 = vmatprep.mubr.msk.f32.mxu0 %vm6732_vm0, %v7943_v52  ;;  %5942 = vmatpush3.bf16.msra.mxu0 %v5941_v31  ;;  %v5944_v32 = vpack.c.bf16 %v1722_v9, %v1721_v44  ;;  %v1732_v44 = vld [vmem:[#allocation10 + $0x68] sm:$0xff] }
 0x43a   :  { %4763 = vmatmul.mubr.f32.vlgmr.msra.gmra.mrb[16].mxu1 %v1142_v1  ;;  %5943 = vmatprep.subr.bf16.mxu0 %v7960_v40  ;;  %v1723_v1 = vld [vmem:[#allocation10 + $0x20] sm:$0xff] }
 0x43b   :  { %4867 = vmatprep.mubr.msk.f32.mxu1 %vm6732_vm0, %v7943_v52 }
 0x43d   :  { %5945 = vmatpush3.bf16.msra.mxu0 %v5944_v32 }
 0x43e   :  { %5946 = vmatprep.subr.bf16.mxu0 %v7960_v40 }
 0x44b   :  { %v1209_v13 = vpop.f32.mrb[10].mxu0 }
 0x44c   :  { %v4519_v18 = vpop.f32.mrb[11].mxu0 }
 0x44d   :  { %v5947_v18 = vpack.c.bf16 %v1724_v50, %v1723_v1  ;;  %v1731_v50 = vld [vmem:[#allocation10 + $0x60] sm:$0xff] }
 0x44e   :  { %v5959_v9 = vpack.c.bf16 %v1732_v44, %v1731_v50  ;;  %v1703_v1 = vld [vmem:[#allocation8] sm:$0xff]  ;;  %v1709_v44 = vld [vmem:[#allocation8 + $0x30] sm:$0xff] }
 0x44f   :  { %v1279_v36 = vpop.f32.mrb[10].mxu1  ;;  %5948 = vmatpush3.bf16.msra.mxu0 %v5947_v18  ;;  %v1704_v18 = vld [vmem:[#allocation8 + $0x8] sm:$0xff] }
 0x450   :  { %v1813_v26 = vrot.slane %v1279_v36, 7  ;;  %v4554_v7 = vpop.f32.mrb[11].mxu1  ;;  %v5950_v36 = vpack.c.bf16 %v1726_v61, %v1725_v57  ;;  %5949 = vmatprep.subr.bf16.mxu0 %v7960_v40  ;;  %v1733_v61 = vld [vmem:[#allocation10 + $0x70] sm:$0xff]  ;;  %v1734_v57 = vld [vmem:[#allocation10 + $0x78] sm:$0xff] }
 0x451   :  { %v1727_v7 = vld [vmem:[#allocation10 + $0x40] sm:$0xff]  ;;  %v5962_v32 = vpack.c.bf16 %v1734_v57, %v1733_v61 }
 0x452   :  { %v7401_v41 = vsel %vm1814_vm3, %v1813_v26, %v1209_v13  ;;  %v5953_v13 = vpack.c.bf16 %v1728_v60, %v1727_v7  ;;  %v1729_v26 = vld [vmem:[#allocation10 + $0x50] sm:$0xff]  ;;  %v1706_v60 = vld [vmem:[#allocation8 + $0x18] sm:$0xff]  ;;  %v1711_v57 = vld [vmem:[#allocation8 + $0x40] sm:$0xff] }
 0x453   :  { %5951 = vmatpush3.bf16.msra.mxu0 %v5950_v36  ;;  %v5956_v31 = vpack.c.bf16 %v1730_v4, %v1729_v26  ;;  %v5965_v36 = vpack.c.bf16 %v1704_v18, %v1703_v1  ;;  %v1705_v7 = vld [vmem:[#allocation8 + $0x10] sm:$0xff]  ;;  %v1707_v4 = vld [vmem:[#allocation8 + $0x20] sm:$0xff] }
 0x454   :  { %5952 = vmatprep.subr.bf16.mxu0 %v7960_v40  ;;  %v5968_v26 = vpack.c.bf16 %v1706_v60, %v1705_v7  ;;  %v1713_v18 = vld [vmem:[#allocation8 + $0x50] sm:$0xff]  ;;  %v1715_v60 = vld [vmem:[#allocation8 + $0x60] sm:$0xff] }
 0x457   :  { %5954 = vmatpush3.bf16.msra.mxu0 %v5953_v13  ;;  %v6532_v13 = vld [vmem:[#allocation2] sm:$0xff] }
 0x458   :  { %5955 = vmatprep.subr.bf16.mxu0 %v7960_v40 }
 0x45b   :  { %5957 = vmatpush3.bf16.msra.mxu0 %v5956_v31  ;;  %v1708_v31 = vld [vmem:[#allocation8 + $0x28] sm:$0xff] }
 0x45c   :  { %5958 = vmatprep.subr.bf16.mxu0 %v7960_v40  ;;  %v5971_v50 = vpack.c.bf16 %v1708_v31, %v1707_v4  ;;  %v1717_v31 = vld [vmem:[#allocation8 + $0x70] sm:$0xff] }
 0x45f   :  { %5960 = vmatpush3.bf16.msra.mxu0 %v5959_v9  ;;  %v1710_v9 = vld [vmem:[#allocation8 + $0x38] sm:$0xff] }
 0x460   :  { %5961 = vmatprep.subr.bf16.mxu0 %v7960_v40  ;;  %v5974_v61 = vpack.c.bf16 %v1710_v9, %v1709_v44 }
 0x463   :  { %5963 = vmatpush3.bf16.msra.mxu0 %v5962_v32  ;;  %v1712_v32 = vld [vmem:[#allocation8 + $0x48] sm:$0xff] }
 0x464   :  { %5964 = vmatprep.subr.bf16.mxu0 %v7960_v40  ;;  %v5977_v1 = vpack.c.bf16 %v1712_v32, %v1711_v57 }
 0x466   :  { %4798 = vmatmul.mubr.f32.vlgmr.msra.gmra.mrb[18].mxu0 %v6532_v13  ;;  %v1716_v13 = vld [vmem:[#allocation8 + $0x68] sm:$0xff] }
 0x467   :  { %5966 = vmatpush3.bf16.msra.mxu0 %v5965_v36  ;;  %4832 = vmatprep.mubr.msk.f32.mxu0 %vm6732_vm0, %v7943_v52  ;;  %v1714_v36 = vld [vmem:[#allocation8 + $0x58] sm:$0xff] }
 0x468   :  { %5967 = vmatprep.subr.bf16.mxu0 %v7960_v40  ;;  %v5980_v7 = vpack.c.bf16 %v1714_v36, %v1713_v18  ;;  %v1908_v36 = vld [vmem:[#allocation7 + $0x80] sm:$0xff] }
 0x46b   :  { %5969 = vmatpush3.bf16.msra.mxu0 %v5968_v26  ;;  %v5983_v26 = vpack.c.bf16 %v1716_v13, %v1715_v60  ;;  %v1910_v60 = vld [vmem:[#allocation7 + $0x90] sm:$0xff] }
 0x46c   :  { %5970 = vmatprep.subr.bf16.mxu0 %v7960_v40 }
 0x46f   :  { %5972 = vmatpush3.bf16.msra.mxu0 %v5971_v50  ;;  %v1718_v50 = vld [vmem:[#allocation8 + $0x78] sm:$0xff] }
 0x470   :  { %5973 = vmatprep.subr.bf16.mxu0 %v7960_v40 }
 0x473   :  { %5975 = vmatpush3.bf16.msra.mxu0 %v5974_v61  ;;  %v5986_v61 = vpack.c.bf16 %v1718_v50, %v1717_v31  ;;  %v1912_v31 = vld [vmem:[#allocation7 + $0xa0] sm:$0xff] }
 0x474   :  { %5976 = vmatprep.subr.bf16.mxu0 %v7960_v40 }
 0x477   :  { %5978 = vmatpush3.bf16.msra.mxu0 %v5977_v1 }
 0x478   :  { %5979 = vmatprep.subr.bf16.mxu0 %v7960_v40 }
 0x47b   :  { %5981 = vmatpush3.bf16.msra.mxu0 %v5980_v7  ;;  %v1909_v7 = vld [vmem:[#allocation7 + $0x88] sm:$0xff] }
 0x47c   :  { %5982 = vmatprep.subr.bf16.mxu0 %v7960_v40 }
 0x47f   :  { %5984 = vmatpush3.bf16.msra.mxu0 %v5983_v26  ;;  %v5989_v26 = vpack.c.bf16 %v1909_v7, %v1908_v36 }
 0x480   :  { %5985 = vmatprep.subr.bf16.mxu0 %v7960_v40 }
 0x481   :  { %5990 = vmatpush3.bf16.msra.mxu1 %v5989_v26 }
 0x482   :  { %5991 = vmatprep.subr.bf16.mxu1 %v7960_v40 }
 0x483   :  { %5987 = vmatpush3.bf16.msra.mxu0 %v5986_v61 }
 0x484   :  { %6036 = vmatprep.subr.bf16.mxu0 %v7960_v40 }
 0x48b   :  { %v1349_v4 = vpop.f32.mrb[12].mxu0 }
 0x48c   :  { %v1816_v44 = vrot.slane %v1349_v4, 6  ;;  %v4589_v9 = vpop.f32.mrb[13].mxu0  ;;  %v5992_v4 = vpack.c.bf16 %v1911_v43, %v1910_v60 }
 0x48d   :  { %v1915_v9 = vld [vmem:[#allocation7 + $0xb8] sm:$0xff] }
 0x48e   :  { %v1818_v57 = vsel %vm1817_vm4, %v1816_v44, %v7401_v41  ;;  %v1913_v41 = vld [vmem:[#allocation7 + $0xa8] sm:$0xff]  ;;  %5993 = vmatpush3.bf16.msra.mxu1 %v5992_v4  ;;  %v1914_v44 = vld [vmem:[#allocation7 + $0xb0] sm:$0xff] }
 0x48f   :  { %v1419_v32 = vpop.f32.mrb[12].mxu1  ;;  %v5995_v50 = vpack.c.bf16 %v1913_v41, %v1912_v31  ;;  %5994 = vmatprep.subr.bf16.mxu1 %v7960_v40  ;;  %v5998_v61 = vpack.c.bf16 %v1915_v9, %v1914_v44 }
 0x490   :  { %v1819_v1 = vrot.slane %v1419_v32, 5  ;;  %v4624_v18 = vpop.f32.mrb[13].mxu1  ;;  %v1916_v32 = vld [vmem:[#allocation7 + $0xc0] sm:$0xff] }
 0x492   :  { %v1821_v13 = vsel %vm1820_vm5, %v1819_v1, %v1818_v57  ;;  %5996 = vmatpush3.bf16.msra.mxu1 %v5995_v50  ;;  %v1917_v57 = vld [vmem:[#allocation7 + $0xc8] sm:$0xff] }
 0x493   :  { %5997 = vmatprep.subr.bf16.mxu1 %v7960_v40  ;;  %v6001_v1 = vpack.c.bf16 %v1917_v57, %v1916_v32 }
 0x496   :  { %5999 = vmatpush3.bf16.msra.mxu1 %v5998_v61 }
 0x497   :  { %6000 = vmatprep.subr.bf16.mxu1 %v7960_v40 }
 0x49a   :  { %6002 = vmatpush3.bf16.msra.mxu1 %v6001_v1 }
 0x49b   :  { %6003 = vmatprep.subr.bf16.mxu1 %v7960_v40 }
 0x4cb   :  { %v1489_v43 = vpop.f32.mrb[14].mxu0 }
 0x4cc   :  { %v1822_v18 = vrot.slane %v1489_v43, 4  ;;  %v4659_v36 = vpop.f32.mrb[15].mxu0  ;;  %v1918_v43 = vld [vmem:[#allocation7 + $0xd0] sm:$0xff] }
 0x4cd   :  { %v1559_v7 = vpop.f32.mrb[14].mxu1 }
 0x4ce   :  { %v1824_v60 = vsel %vm1823_vm6, %v1822_v18, %v1821_v13  ;;  %v1825_v26 = vrot.slane %v1559_v7, 3  ;;  %v4694_v4 = vpop.f32.mrb[15].mxu1  ;;  %v7973_v13 = vld [vmem:[#allocation29_spill] sm:$0xff]  ;;  %v1919_v18 = vld [vmem:[#allocation7 + $0xd8] sm:$0xff]  ;;  %v1920_v7 = vld [vmem:[#allocation7 + $0xe0] sm:$0xff] }
 0x4cf   :  { %v6004_v36 = vpack.c.bf16 %v1919_v18, %v1918_v43  ;;  %v1922_v4 = vld [vmem:[#allocation7 + $0xf0] sm:$0xff]  ;;  %v7978_v43 = vld [vmem:[#allocation24_spill] sm:$0xff]  ;;  %v7979_v18 = vld [vmem:[#allocation25_spill] sm:$0xff] }
 0x4d0   :  { %v1827_v31 = vsel %vm1826_vm7, %v1825_v26, %v1824_v60  ;;  %v1921_v60 = vld [vmem:[#allocation7 + $0xe8] sm:$0xff] }
 0x4d1   :  { %6005 = vmatpush3.bf16.msra.mxu1 %v6004_v36  ;;  %v6007_v26 = vpack.c.bf16 %v1921_v60, %v1920_v7  ;;  %v7980_v36 = vld [vmem:[#allocation26_spill] sm:$0xff]  ;;  %v7981_v7 = vld [vmem:[#allocation27_spill] sm:$0xff]  ;;  %v7982_v60 = vld [vmem:[#allocation28_spill] sm:$0xff] }
 0x4d2   :  { %6006 = vmatprep.subr.bf16.mxu1 %v7960_v40 }
 0x4d5   :  { %6008 = vmatpush3.bf16.msra.mxu1 %v6007_v26  ;;  %v7983_v26 = vld [vmem:[#allocation30_spill] sm:$0xff] }
 0x4d6   :  { %6009 = vmatprep.subr.bf16.mxu1 %v7960_v40 }
 0x50b   :  { %v1629_v41 = vpop.f32.mrb[16].mxu0 }
 0x50c   :  { %v1828_v50 = vrot.slane %v1629_v41, 2  ;;  %v4729_v44 = vpop.f32.mrb[17].mxu0 }
 0x50d   :  { %v1699_v9 = vpop.f32.mrb[16].mxu1  ;;  %v7974_v44 = vld [vmem:[#allocation32_spill] sm:$0xff] }
 0x50e   :  { %v1830_v61 = vsel %vm1829_vm8, %v1828_v50, %v1827_v31  ;;  %v1831_v32 = vrot.slane %v1699_v9, 1  ;;  %v4764_v57 = vpop.f32.mrb[17].mxu1  ;;  %v1923_v31 = vld [vmem:[#allocation7 + $0xf8] sm:$0xff] }
 0x50f   :  { %v6010_v41 = vpack.c.bf16 %v1923_v31, %v1922_v4  ;;  %v7976_v57 = vld [vmem:[#allocation22_spill] sm:$0xff]  ;;  %v7984_v31 = vld [vmem:[#allocation31_spill] sm:$0xff] }
 0x510   :  { %v1833_v1 = vsel %vm1832_vm9, %v1831_v32, %v1830_v61 }
 0x511   :  { %4833 = vmatmul.mubr.f32.vlgmr.msra.gmra.mrb[18].mxu0 %v1833_v1  ;;  %6011 = vmatpush3.bf16.msra.mxu1 %v6010_v41  ;;  %v7977_v1 = vld [vmem:[#allocation23_spill] sm:$0xff] }
 0x512   :  { %6038 = vmatpush3.bf16.xpose.msra.mxu0 %v6875_v15  ;;  %4937 = vmatprep.mubr.msk.f32.mxu0 %vm6732_vm0, %v7943_v52 }
 0x513   :  { %6039 = vmatprep.subr.bf16.mxu0 %v7960_v40  ;;  %6012 = vmatprep.subr.bf16.mxu1 %v7960_v40 }
 0x51a   :  { %6041 = vmatpush3.bf16.xpose.msra.mxu0 %v6884_v21 }
 0x51b   :  { %6042 = vmatprep.subr.bf16.mxu0 %v7960_v40 }
 0x522   :  { %6044 = vmatpush3.bf16.xpose.msra.mxu0 %v6892_v27 }
 0x523   :  { %6045 = vmatprep.subr.bf16.mxu0 %v7960_v40 }
 0x52a   :  { %6047 = vmatpush3.bf16.xpose.msra.mxu0 %v6900_v33 }
 0x52b   :  { %6048 = vmatprep.subr.bf16.mxu0 %v7960_v40 }
 0x532   :  { %6050 = vmatpush3.bf16.xpose.msra.mxu0 %v6908_v39 }
 0x533   :  { %6051 = vmatprep.subr.bf16.mxu0 %v7960_v40 }
 0x53a   :  { %6053 = vmatpush3.bf16.xpose.msra.mxu0 %v6916_v45 }
 0x53b   :  { %6054 = vmatprep.subr.bf16.mxu0 %v7960_v40 }
 0x542   :  { %6056 = vmatpush3.bf16.xpose.msra.mxu0 %v6924_v51 }
 0x543   :  { %6057 = vmatprep.subr.bf16.mxu0 %v7960_v40 }
 0x54a   :  { %6059 = vmatpush3.bf16.xpose.msra.mxu0 %v7973_v13 }
 0x54b   :  { %6084 = vmatprep.subr.bf16.mxu0 %v7960_v40 }
 0x5e4   :  { %v1901_v50 = vpop.f32.mrb[18].mxu0 }
 0x5e5   :  { %v1905_v9 = vadd.f32 %v1901_v50, %v7974_v44  ;;  %v4834_v61 = vpop.f32.mrb[19].mxu0 }
 0x5e7   :  { %6496 = vtanh.f32 %v1905_v9 }
 0x5f1   :  { %v7455_v32 = vpop.eup %6496 }
 0x5f2   :  { %7975 = vst [vmem:[#allocation34_spill] sm:$0xff] %v7455_v32  ;;  %4868 = vmatmul.mubr.f32.vlgmr.msra.gmra.mrb[18].mxu1 %v7455_v32  ;;  %v7990_v32 = vld [vmem:[#allocation45_spill] sm:$0xff] }
 0x5f3   :  { %6014 = vmatpush3.bf16.xpose.msra.mxu1 %v7976_v57  ;;  %4902 = vmatprep.mubr.msk.f32.mxu1 %vm6732_vm0, %v7943_v52 }
 0x5f4   :  { %6015 = vmatprep.subr.bf16.mxu1 %v7960_v40 }
 0x5fb   :  { %6017 = vmatpush3.bf16.xpose.msra.mxu1 %v7977_v1 }
 0x5fc   :  { %6018 = vmatprep.subr.bf16.mxu1 %v7960_v40 }
 0x603   :  { %6020 = vmatpush3.bf16.xpose.msra.mxu1 %v7978_v43 }
 0x604   :  { %6021 = vmatprep.subr.bf16.mxu1 %v7960_v40 }
 0x60b   :  { %6023 = vmatpush3.bf16.xpose.msra.mxu1 %v7979_v18 }
 0x60c   :  { %6024 = vmatprep.subr.bf16.mxu1 %v7960_v40 }
 0x613   :  { %6026 = vmatpush3.bf16.xpose.msra.mxu1 %v7980_v36 }
 0x614   :  { %6027 = vmatprep.subr.bf16.mxu1 %v7960_v40 }
 0x61b   :  { %6029 = vmatpush3.bf16.xpose.msra.mxu1 %v7981_v7 }
 0x61c   :  { %6030 = vmatprep.subr.bf16.mxu1 %v7960_v40 }
 0x623   :  { %6032 = vmatpush3.bf16.xpose.msra.mxu1 %v7982_v60 }
 0x624   :  { %6033 = vmatprep.subr.bf16.mxu1 %v7960_v40 }
 0x62b   :  { %6035 = vmatpush3.bf16.xpose.msra.mxu1 %v7983_v26 }
 0x62c   :  { %6060 = vmatprep.subr.bf16.mxu1 %v7960_v40 }
 0x6c5   :  { %v7476_v4 = vpop.f32.mrb[18].mxu1 }
 0x6c6   :  { %v2002_v41 = vrot.slane %v7476_v4, %v7984_v31  ;;  %v4869_v50 = vpop.f32.mrb[19].mxu1 }
 0x6c8   :  { %v2010_v44 = vcombine.high %v2002_v41, %v2002_v41  ;;  %v2018_v9 = vrot.slane %v2002_v41, %v7984_v31 }
 0x6ca   :  { %v2032_v61 = vrot.slane %v2010_v44, %v7984_v31  ;;  %4903 = vmatmul.mubr.f32.vlgmr.msra.gmra.mrb[20].mxu1 %v2018_v9  ;;  %v2040_v41 = vcombine.high %v2018_v9, %v2018_v9  ;;  %v1995_v44 = vcombine.high %v7476_v4, %v7476_v4  ;;  %v7985_v4 = vld [vmem:[#allocation40_spill] sm:$0xff] }
 0x6cb   :  { %6062 = vmatpush3.bf16.xpose.msra.mxu1 %v6949_v12  ;;  %4972 = vmatprep.mubr.msk.f32.mxu1 %vm6732_vm0, %v7943_v52 }
 0x6cc   :  { %4938 = vmatmul.mubr.f32.vlgmr.msra.gmra.mrb[20].mxu0 %v2032_v61  ;;  %6063 = vmatprep.subr.bf16.mxu1 %v7960_v40  ;;  %v2042_v50 = vcombine.high %v2032_v61, %v2032_v61  ;;  %v2009_v9 = vrot.slane %v1995_v44, %v7984_v31  ;;  %v7987_v44 = vld [vmem:[#allocation42_spill] sm:$0xff] }
 0x6cd   :  { %6086 = vmatpush3.bf16.xpose.msra.mxu0 %v6954_v16  ;;  %5007 = vmatprep.mubr.msk.f32.mxu0 %vm6732_vm0, %v7943_v52 }
 0x6ce   :  { %6087 = vmatprep.subr.bf16.mxu0 %v7960_v40  ;;  %v2011_v61 = vcombine.high %v2009_v9, %v2009_v9 }
 0x6d3   :  { %6065 = vmatpush3.bf16.xpose.msra.mxu1 %v6969_v24 }
 0x6d4   :  { %6066 = vmatprep.subr.bf16.mxu1 %v7960_v40 }
 0x6d5   :  { %6089 = vmatpush3.bf16.xpose.msra.mxu0 %v6971_v25 }
 0x6d6   :  { %6090 = vmatprep.subr.bf16.mxu0 %v7960_v40 }
 0x6db   :  { %6068 = vmatpush3.bf16.xpose.msra.mxu1 %v6977_v34 }
 0x6dc   :  { %6069 = vmatprep.subr.bf16.mxu1 %v7960_v40 }
 0x6dd   :  { %6092 = vmatpush3.bf16.xpose.msra.mxu0 %v6979_v35 }
 0x6de   :  { %6093 = vmatprep.subr.bf16.mxu0 %v7960_v40 }
 0x6e3   :  { %6071 = vmatpush3.bf16.xpose.msra.mxu1 %v6989_v46 }
 0x6e4   :  { %6072 = vmatprep.subr.bf16.mxu1 %v7960_v40 }
 0x6e5   :  { %6095 = vmatpush3.bf16.xpose.msra.mxu0 %v6991_v47 }
 0x6e6   :  { %6096 = vmatprep.subr.bf16.mxu0 %v7960_v40 }
 0x6eb   :  { %6074 = vmatpush3.bf16.xpose.msra.mxu1 %v6997_v54 }
 0x6ec   :  { %6075 = vmatprep.subr.bf16.mxu1 %v7960_v40 }
 0x6ed   :  { %6098 = vmatpush3.bf16.xpose.msra.mxu0 %v6999_v55 }
 0x6ee   :  { %6099 = vmatprep.subr.bf16.mxu0 %v7960_v40 }
 0x6f3   :  { %6077 = vmatpush3.bf16.xpose.msra.mxu1 %v7005_v2 }
 0x6f4   :  { %6078 = vmatprep.subr.bf16.mxu1 %v7960_v40 }
 0x6f5   :  { %6101 = vmatpush3.bf16.xpose.msra.mxu0 %v7007_v3 }
 0x6f6   :  { %6102 = vmatprep.subr.bf16.mxu0 %v7960_v40 }
 0x6fb   :  { %6080 = vmatpush3.bf16.xpose.msra.mxu1 %v7013_v10 }
 0x6fc   :  { %6081 = vmatprep.subr.bf16.mxu1 %v7960_v40 }
 0x6fd   :  { %6104 = vmatpush3.bf16.xpose.msra.mxu0 %v7015_v11 }
 0x6fe   :  { %6105 = vmatprep.subr.bf16.mxu0 %v7960_v40 }
 0x703   :  { %6083 = vmatpush3.bf16.xpose.msra.mxu1 %v7021_v23 }
 0x704   :  { %6108 = vmatprep.subr.bf16.mxu1 %v7960_v40 }
 0x705   :  { %6107 = vmatpush3.bf16.xpose.msra.mxu0 %v7023_v28 }
 0x706   :  { %6132 = vmatprep.subr.bf16.mxu0 %v7960_v40 }
 0x70a   :  { %4973 = vmatmul.mubr.f32.vlgmr.msra.gmra.mrb[22].mxu1 %v2040_v41  ;;  %v2025_v41 = vrot.slane %v2009_v9, %v7984_v31  ;;  %v7988_v9 = vld [vmem:[#allocation43_spill] sm:$0xff] }
 0x70b   :  { %6110 = vmatpush3.bf16.xpose.msra.mxu1 %v7029_v37  ;;  %5042 = vmatprep.mubr.msk.f32.mxu1 %vm6732_vm0, %v7943_v52 }
 0x70c   :  { %5008 = vmatmul.mubr.f32.vlgmr.msra.gmra.mrb[22].mxu0 %v2042_v50  ;;  %6111 = vmatprep.subr.bf16.mxu1 %v7960_v40  ;;  %v2039_v50 = vrot.slane %v2011_v61, %v7984_v31  ;;  %v7986_v31 = vld [vmem:[#allocation41_spill] sm:$0xff]  ;;  %v7989_v61 = vld [vmem:[#allocation44_spill] sm:$0xff] }
 0x70d   :  { %6134 = vmatpush3.bf16.xpose.msra.mxu0 %v7033_v42  ;;  %5077 = vmatprep.mubr.msk.f32.mxu0 %vm6732_vm0, %v7943_v52 }
 0x70e   :  { %6135 = vmatprep.subr.bf16.mxu0 %v7960_v40 }
 0x713   :  { %6113 = vmatpush3.bf16.xpose.msra.mxu1 %v7045_v17 }
 0x714   :  { %6114 = vmatprep.subr.bf16.mxu1 %v7960_v40 }
 0x715   :  { %6137 = vmatpush3.bf16.xpose.msra.mxu0 %v7047_v58 }
 0x716   :  { %6138 = vmatprep.subr.bf16.mxu0 %v7960_v40 }
 0x71b   :  { %6116 = vmatpush3.bf16.xpose.msra.mxu1 %v7053_v6 }
 0x71c   :  { %6117 = vmatprep.subr.bf16.mxu1 %v7960_v40 }
 0x71d   :  { %6140 = vmatpush3.bf16.xpose.msra.mxu0 %v7055_v8 }
 0x71e   :  { %6141 = vmatprep.subr.bf16.mxu0 %v7960_v40 }
 0x723   :  { %6119 = vmatpush3.bf16.xpose.msra.mxu1 %v7061_v22 }
 0x724   :  { %6120 = vmatprep.subr.bf16.mxu1 %v7960_v40 }
 0x725   :  { %6143 = vmatpush3.bf16.xpose.msra.mxu0 %v7063_v29 }
 0x726   :  { %6144 = vmatprep.subr.bf16.mxu0 %v7960_v40 }
 0x72b   :  { %6122 = vmatpush3.bf16.xpose.msra.mxu1 %v7069_v48 }
 0x72c   :  { %6123 = vmatprep.subr.bf16.mxu1 %v7960_v40 }
 0x72d   :  { %6146 = vmatpush3.bf16.xpose.msra.mxu0 %v7071_v49 }
 0x72e   :  { %6147 = vmatprep.subr.bf16.mxu0 %v7960_v40 }
 0x733   :  { %6125 = vmatpush3.bf16.xpose.msra.mxu1 %v7077_v62 }
 0x734   :  { %6126 = vmatprep.subr.bf16.mxu1 %v7960_v40 }
 0x735   :  { %6149 = vmatpush3.bf16.xpose.msra.mxu0 %v7079_v63 }
 0x736   :  { %6150 = vmatprep.subr.bf16.mxu0 %v7960_v40 }
 0x73b   :  { %6128 = vmatpush3.bf16.xpose.msra.mxu1 %v7085_v19 }
 0x73c   :  { %6129 = vmatprep.subr.bf16.mxu1 %v7960_v40 }
 0x73d   :  { %6152 = vmatpush3.bf16.xpose.msra.mxu0 %v7087_v30 }
 0x73e   :  { %6153 = vmatprep.subr.bf16.mxu0 %v7960_v40 }
 0x743   :  { %6131 = vmatpush3.bf16.xpose.msra.mxu1 %v7095_v53 }
 0x744   :  { %6156 = vmatprep.subr.bf16.mxu1 %v7960_v40 }
 0x745   :  { %6155 = vmatpush3.bf16.xpose.msra.mxu0 %v7097_v59 }
 0x746   :  { %6180 = vmatprep.subr.bf16.mxu0 %v7960_v40 }
 0x74a   :  { %5043 = vmatmul.mubr.f32.vlgmr.msra.gmra.mrb[24].mxu1 %v2025_v41 }
 0x74b   :  { %6158 = vmatpush3.bf16.xpose.msra.mxu1 %v7961_v20  ;;  %5112 = vmatprep.mubr.msk.f32.mxu1 %vm6732_vm0, %v7943_v52 }
 0x74c   :  { %5078 = vmatmul.mubr.f32.vlgmr.msra.gmra.mrb[24].mxu0 %v2039_v50  ;;  %6159 = vmatprep.subr.bf16.mxu1 %v7960_v40 }
 0x74d   :  { %6182 = vmatpush3.bf16.xpose.msra.mxu0 %v7962_v0  ;;  %5147 = vmatprep.mubr.msk.f32.mxu0 %vm6732_vm0, %v7943_v52 }
 0x74e   :  { %6183 = vmatprep.subr.bf16.mxu0 %v7960_v40 }
 0x753   :  { %6161 = vmatpush3.bf16.xpose.msra.mxu1 %v7963_v56 }
 0x754   :  { %6162 = vmatprep.subr.bf16.mxu1 %v7960_v40 }
 0x755   :  { %6185 = vmatpush3.bf16.xpose.msra.mxu0 %v7964_v38 }
 0x756   :  { %6186 = vmatprep.subr.bf16.mxu0 %v7960_v40 }
 0x75b   :  { %6164 = vmatpush3.bf16.xpose.msra.mxu1 %v7965_v14 }
 0x75c   :  { %6165 = vmatprep.subr.bf16.mxu1 %v7960_v40 }
 0x75d   :  { %6188 = vmatpush3.bf16.xpose.msra.mxu0 %v7966_v5 }
 0x75e   :  { %6189 = vmatprep.subr.bf16.mxu0 %v7960_v40 }
 0x763   :  { %6167 = vmatpush3.bf16.xpose.msra.mxu1 %v7985_v4  ;;  %v7991_v4 = vld [vmem:[#allocation46_spill] sm:$0xff] }
 0x764   :  { %6168 = vmatprep.subr.bf16.mxu1 %v7960_v40 }
 0x765   :  { %6191 = vmatpush3.bf16.xpose.msra.mxu0 %v7986_v31  ;;  %v7992_v31 = vld [vmem:[#allocation47_spill] sm:$0xff] }
 0x766   :  { %6192 = vmatprep.subr.bf16.mxu0 %v7960_v40 }
 0x76b   :  { %6170 = vmatpush3.bf16.xpose.msra.mxu1 %v7987_v44  ;;  %v7993_v44 = vld [vmem:[#allocation48_spill] sm:$0xff] }
 0x76c   :  { %6171 = vmatprep.subr.bf16.mxu1 %v7960_v40 }
 0x76d   :  { %6194 = vmatpush3.bf16.xpose.msra.mxu0 %v7988_v9  ;;  %v7994_v9 = vld [vmem:[#allocation49_spill] sm:$0xff] }
 0x76e   :  { %6195 = vmatprep.subr.bf16.mxu0 %v7960_v40 }
 0x773   :  { %6173 = vmatpush3.bf16.xpose.msra.mxu1 %v7989_v61  ;;  %v2041_v61 = vcombine.high %v2025_v41, %v2025_v41 }
 0x774   :  { %6174 = vmatprep.subr.bf16.mxu1 %v7960_v40 }
 0x775   :  { %6197 = vmatpush3.bf16.xpose.msra.mxu0 %v7990_v32  ;;  %v2043_v32 = vcombine.high %v2039_v50, %v2039_v50 }
 0x776   :  { %6198 = vmatprep.subr.bf16.mxu0 %v7960_v40 }
 0x77b   :  { %6176 = vmatpush3.bf16.xpose.msra.mxu1 %v7991_v4 }
 0x77c   :  { %6177 = vmatprep.subr.bf16.mxu1 %v7960_v40 }
 0x77d   :  { %6200 = vmatpush3.bf16.xpose.msra.mxu0 %v7992_v31 }
 0x77e   :  { %6201 = vmatprep.subr.bf16.mxu0 %v7960_v40 }
 0x783   :  { %6179 = vmatpush3.bf16.xpose.msra.mxu1 %v7993_v44 }
 0x784   :  { %6204 = vmatprep.subr.bf16.mxu1 %v7960_v40 }
 0x785   :  { %6203 = vmatpush3.bf16.xpose.msra.mxu0 %v7994_v9 }
 0x786   :  { %6228 = vmatprep.subr.bf16.mxu0 %v7960_v40 }
 0x78a   :  { %5113 = vmatmul.mubr.f32.vlgmr.msra.gmra.mrb[26].mxu1 %v2041_v61 }
 0x78b   :  { %6206 = vmatpush3.bf16.msra.mxu1 %v7976_v57  ;;  %5182 = vmatprep.mubr.msk.f32.mxu1 %vm6732_vm0, %v7943_v52 }
 0x78c   :  { %5148 = vmatmul.mubr.f32.vlgmr.msra.gmra.mrb[26].mxu0 %v2043_v32  ;;  %6207 = vmatprep.subr.bf16.mxu1 %v7960_v40 }
 0x78d   :  { %6230 = vmatpush3.bf16.msra.mxu0 %v6875_v15  ;;  %5217 = vmatprep.mubr.msk.f32.mxu0 %vm6732_vm0, %v7943_v52 }
 0x78e   :  { %6231 = vmatprep.subr.bf16.mxu0 %v7960_v40 }
 0x78f   :  { %6209 = vmatpush3.bf16.msra.mxu1 %v7977_v1 }
 0x790   :  { %6210 = vmatprep.subr.bf16.mxu1 %v7960_v40 }
 0x791   :  { %6233 = vmatpush3.bf16.msra.mxu0 %v6884_v21 }
 0x792   :  { %6234 = vmatprep.subr.bf16.mxu0 %v7960_v40 }
 0x793   :  { %6212 = vmatpush3.bf16.msra.mxu1 %v7978_v43 }
 0x794   :  { %6213 = vmatprep.subr.bf16.mxu1 %v7960_v40 }
 0x795   :  { %6236 = vmatpush3.bf16.msra.mxu0 %v6892_v27 }
 0x796   :  { %6237 = vmatprep.subr.bf16.mxu0 %v7960_v40 }
 0x797   :  { %6215 = vmatpush3.bf16.msra.mxu1 %v7979_v18 }
 0x798   :  { %6216 = vmatprep.subr.bf16.mxu1 %v7960_v40 }
 0x799   :  { %6239 = vmatpush3.bf16.msra.mxu0 %v6900_v33 }
 0x79a   :  { %6240 = vmatprep.subr.bf16.mxu0 %v7960_v40 }
 0x79b   :  { %6218 = vmatpush3.bf16.msra.mxu1 %v7980_v36 }
 0x79c   :  { %6219 = vmatprep.subr.bf16.mxu1 %v7960_v40 }
 0x79d   :  { %v2118_v15 = vpop.f32.mrb[20].mxu1  ;;  %6242 = vmatpush3.bf16.msra.mxu0 %v6908_v39 }
 0x79e   :  { %v2612_v27 = vsel %vm238_vm1, %v2118_v15, -1e+30  ;;  %v4904_v32 = vpop.f32.mrb[21].mxu1  ;;  %6243 = vmatprep.subr.bf16.mxu0 %v7960_v40 }
 0x79f   :  { %v2188_v57 = vpop.f32.mrb[20].mxu0  ;;  %v2620_v1 = vsel %vm1054_vm2, %v2612_v27, -inf  ;;  %6221 = vmatpush3.bf16.msra.mxu1 %v7981_v7 }
 0x7a0   :  { %v2613_v33 = vsel %vm238_vm1, %v2188_v57, -1e+30  ;;  %2621 = vmax.xlane.f32.xlu0 %v2620_v1  ;;  %v4939_v43 = vpop.f32.mrb[21].mxu0  ;;  %6222 = vmatprep.subr.bf16.mxu1 %v7960_v40 }
 0x7a1   :  { %v2623_v39 = vsel %vm1054_vm2, %v2613_v33, -inf  ;;  %6245 = vmatpush3.bf16.msra.mxu0 %v6916_v45 }
 0x7a2   :  { %2624 = vmax.xlane.f32.xlu1 %v2623_v39  ;;  %6246 = vmatprep.subr.bf16.mxu0 %v7960_v40 }
 0x7a3   :  { %6224 = vmatpush3.bf16.msra.mxu1 %v7982_v60 }
 0x7a4   :  { %6225 = vmatprep.subr.bf16.mxu1 %v7960_v40 }
 0x7a5   :  { %6248 = vmatpush3.bf16.msra.mxu0 %v6924_v51 }
 0x7a6   :  { %6249 = vmatprep.subr.bf16.mxu0 %v7960_v40 }
 0x7a7   :  { %6227 = vmatpush3.bf16.msra.mxu1 %v7983_v26 }
 0x7a8   :  { %6252 = vmatprep.subr.bf16.mxu1 %v7960_v40 }
 0x7a9   :  { %6251 = vmatpush3.bf16.msra.mxu0 %v7973_v13 }
 0x7aa   :  { %6276 = vmatprep.subr.bf16.mxu0 %v7960_v40 }
 0x7dd   :  { %v2258_v45 = vpop.f32.mrb[22].mxu1 }
 0x7de   :  { %v2614_v18 = vsel %vm238_vm1, %v2258_v45, -1e+30  ;;  %v4974_v36 = vpop.f32.mrb[23].mxu1 }
 0x7df   :  { %v2328_v7 = vpop.f32.mrb[22].mxu0  ;;  %v2626_v60 = vsel %vm1054_vm2, %v2614_v18, -inf }
 0x7e0   :  { %v2615_v51 = vsel %vm238_vm1, %v2328_v7, -1e+30  ;;  %2627 = vmax.xlane.f32.xlu0 %v2626_v60  ;;  %v5009_v41 = vpop.f32.mrb[23].mxu0 }
 0x7e1   :  { %v2629_v26 = vsel %vm1054_vm2, %v2615_v51, -inf }
 0x7e2   :  { %2630 = vmax.xlane.f32.xlu1 %v2629_v26 }
 0x81d   :  { %v2398_v50 = vpop.f32.mrb[24].mxu1 }
 0x81e   :  { %v2616_v13 = vsel %vm238_vm1, %v2398_v50, -1e+30  ;;  %v5044_v61 = vpop.f32.mrb[25].mxu1 }
 0x81f   :  { %v2468_v15 = vpop.f32.mrb[24].mxu0  ;;  %v2632_v32 = vsel %vm1054_vm2, %v2616_v13, -inf }
 0x820   :  { %v2617_v57 = vsel %vm238_vm1, %v2468_v15, -1e+30  ;;  %2633 = vmax.xlane.f32.xlu0 %v2632_v32  ;;  %v5079_v1 = vpop.f32.mrb[25].mxu0 }
 0x821   :  { %v2635_v43 = vsel %vm1054_vm2, %v2617_v57, -inf }
 0x822   :  { %2636 = vmax.xlane.f32.xlu1 %v2635_v43 }
 0x82d   :  { %v2622_v39 = vpop.xlane.xlu0 %2621 }
 0x82e   :  { %v2644_v45 = vsub.f32 %v2612_v27, %v2622_v39 }
 0x82f   :  { %v2625_v36 = vpop.xlane.xlu1 %2624 }
 0x830   :  { %v2652_v7 = vmul.f32 1.442695, %v2644_v45  ;;  %v2645_v60 = vsub.f32 %v2613_v33, %v2625_v36 }
 0x832   :  { %6498 = vpow2.f32 %v2652_v7  ;;  %v2654_v41 = vmul.f32 1.442695, %v2645_v60 }
 0x834   :  { %6500 = vpow2.f32 %v2654_v41 }
 0x83c   :  { %v6499_v26 = vpop.eup %6498 }
 0x83d   :  { %v2668_v50 = vsel %vm1054_vm2, %v6499_v26, 0.0 }
 0x83e   :  { %v6501_v61 = vpop.eup %6500  ;;  %2669 = vadd.xlane.f32.xlu0 %v2668_v50 }
 0x83f   :  { %v2671_v15 = vsel %vm1054_vm2, %v6501_v61, 0.0 }
 0x840   :  { %2672 = vadd.xlane.f32.xlu1 %v2671_v15 }
 0x85d   :  { %v2538_v32 = vpop.f32.mrb[26].mxu1 }
 0x85e   :  { %v7653_v1 = vsel %vm238_vm1, %v2538_v32, -1e+30  ;;  %v5114_v27 = vpop.f32.mrb[27].mxu1 }
 0x85f   :  { %v2608_v43 = vpop.f32.mrb[26].mxu0  ;;  %v2638_v33 = vsel %vm1054_vm2, %v7653_v1, -inf }
 0x860   :  { %v7659_v39 = vsel %vm238_vm1, %v2608_v43, -1e+30  ;;  %2639 = vmax.xlane.f32.xlu0 %v2638_v33  ;;  %v5149_v45 = vpop.f32.mrb[27].mxu0 }
 0x861   :  { %v2641_v36 = vsel %vm1054_vm2, %v7659_v39, -inf }
 0x862   :  { %2642 = vmax.xlane.f32.xlu1 %v2641_v36 }
 0x86d   :  { %v2628_v7 = vpop.xlane.xlu0 %2627 }
 0x86e   :  { %v2646_v60 = vsub.f32 %v2614_v18, %v2628_v7 }
 0x86f   :  { %v2631_v41 = vpop.xlane.xlu1 %2630 }
 0x870   :  { %v2656_v50 = vmul.f32 1.442695, %v2646_v60  ;;  %v2647_v15 = vsub.f32 %v2615_v51, %v2631_v41 }
 0x872   :  { %6502 = vpow2.f32 %v2656_v50  ;;  %v2658_v32 = vmul.f32 1.442695, %v2647_v15 }
 0x874   :  { %6504 = vpow2.f32 %v2658_v32 }
 0x87c   :  { %v7663_v27 = vpop.eup %6502 }
 0x87d   :  { %v2674_v21 = vsel %vm1054_vm2, %v7663_v27, 0.0 }
 0x87e   :  { %v7667_v43 = vpop.eup %6504  ;;  %2675 = vadd.xlane.f32.xlu0 %v2674_v21 }
 0x87f   :  { %v2677_v33 = vsel %vm1054_vm2, %v7667_v43, 0.0 }
 0x880   :  { %2678 = vadd.xlane.f32.xlu1 %v2677_v33 }
 0x8ad   :  { %v2634_v45 = vpop.xlane.xlu0 %2633 }
 0x8ae   :  { %v2648_v18 = vsub.f32 %v2616_v13, %v2634_v45 }
 0x8af   :  { %v2637_v36 = vpop.xlane.xlu1 %2636 }
 0x8b0   :  { %v2660_v7 = vmul.f32 1.442695, %v2648_v18  ;;  %v2649_v51 = vsub.f32 %v2617_v57, %v2637_v36 }
 0x8b2   :  { %6506 = vpow2.f32 %v2660_v7  ;;  %v2662_v60 = vmul.f32 1.442695, %v2649_v51 }
 0x8b4   :  { %6508 = vpow2.f32 %v2662_v60  ;;  %v3290_v60 = vld [vmem:[#allocation10 + $0xa0] sm:$0xff] }
 0x8bc   :  { %v7671_v41 = vpop.eup %6506 }
 0x8bd   :  { %v2680_v50 = vsel %vm1054_vm2, %v7671_v41, 0.0 }
 0x8be   :  { %v7675_v15 = vpop.eup %6508  ;;  %2681 = vadd.xlane.f32.xlu0 %v2680_v50 }
 0x8bf   :  { %v2683_v32 = vsel %vm1054_vm2, %v7675_v15, 0.0 }
 0x8c0   :  { %2684 = vadd.xlane.f32.xlu1 %v2683_v32 }
 0x8cb   :  { %v2670_v21 = vpop.xlane.xlu0 %2669 }
 0x8cc   :  { %6510 = vrcp.f32 %v2670_v21 }
 0x8cd   :  { %v2673_v13 = vpop.xlane.xlu1 %2672 }
 0x8ce   :  { %6512 = vrcp.f32 %v2673_v13  ;;  %v3292_v13 = vld [vmem:[#allocation10 + $0xb0] sm:$0xff] }
 0x8d6   :  { %v6511_v57 = vpop.eup %6510 }
 0x8d7   :  { %v2700_v33 = vmul.f32 %v6511_v57, %v6499_v26  ;;  %v3293_v57 = vld [vmem:[#allocation10 + $0xb8] sm:$0xff] }
 0x8d8   :  { %v6513_v45 = vpop.eup %6512 }
 0x8d9   :  { %5183 = vmatmul.mubr.f32.vlgmr.msra.gmra.mrb[28].mxu1 %v2700_v33  ;;  %v2701_v18 = vmul.f32 %v6513_v45, %v6501_v61  ;;  %v3294_v45 = vld [vmem:[#allocation10 + $0xc0] sm:$0xff] }
 0x8da   :  { %6254 = vmatpush3.bf16.msra.mxu1 %v6949_v12  ;;  %5252 = vmatprep.mubr.msk.f32.mxu1 %vm6732_vm0, %v7943_v52 }
 0x8db   :  { %5218 = vmatmul.mubr.f32.vlgmr.msra.gmra.mrb[28].mxu0 %v2701_v18  ;;  %v3476_v36 = vrot.slane %v2701_v18, 7  ;;  %6255 = vmatprep.subr.bf16.mxu1 %v7960_v40  ;;  %v3295_v18 = vld [vmem:[#allocation10 + $0xc8] sm:$0xff] }
 0x8dc   :  { %6278 = vmatpush3.bf16.msra.mxu0 %v6954_v16  ;;  %5287 = vmatprep.mubr.msk.f32.mxu0 %vm6732_vm0, %v7943_v52 }
 0x8dd   :  { %v3477_v7 = vsel %vm1814_vm3, %v3476_v36, %v2700_v33  ;;  %6279 = vmatprep.subr.bf16.mxu0 %v7960_v40  ;;  %v6406_v33 = vpack.c.bf16 %v3293_v57, %v3292_v13  ;;  %v6409_v36 = vpack.c.bf16 %v3295_v18, %v3294_v45 }
 0x8de   :  { %6257 = vmatpush3.bf16.msra.mxu1 %v6969_v24 }
 0x8df   :  { %6258 = vmatprep.subr.bf16.mxu1 %v7960_v40 }
 0x8e0   :  { %6281 = vmatpush3.bf16.msra.mxu0 %v6971_v25 }
 0x8e1   :  { %6282 = vmatprep.subr.bf16.mxu0 %v7960_v40 }
 0x8e2   :  { %6260 = vmatpush3.bf16.msra.mxu1 %v6977_v34 }
 0x8e3   :  { %6261 = vmatprep.subr.bf16.mxu1 %v7960_v40 }
 0x8e4   :  { %6284 = vmatpush3.bf16.msra.mxu0 %v6979_v35 }
 0x8e5   :  { %6285 = vmatprep.subr.bf16.mxu0 %v7960_v40 }
 0x8e6   :  { %6263 = vmatpush3.bf16.msra.mxu1 %v6989_v46 }
 0x8e7   :  { %6264 = vmatprep.subr.bf16.mxu1 %v7960_v40 }
 0x8e8   :  { %6287 = vmatpush3.bf16.msra.mxu0 %v6991_v47 }
 0x8e9   :  { %6288 = vmatprep.subr.bf16.mxu0 %v7960_v40 }
 0x8ea   :  { %6266 = vmatpush3.bf16.msra.mxu1 %v6997_v54 }
 0x8eb   :  { %6267 = vmatprep.subr.bf16.mxu1 %v7960_v40 }
 0x8ec   :  { %6290 = vmatpush3.bf16.msra.mxu0 %v6999_v55 }
 0x8ed   :  { %v2640_v12 = vpop.xlane.xlu0 %2639  ;;  %6291 = vmatprep.subr.bf16.mxu0 %v7960_v40 }
 0x8ee   :  { %v2650_v16 = vsub.f32 %v7653_v1, %v2640_v12  ;;  %6269 = vmatpush3.bf16.msra.mxu1 %v7005_v2  ;;  %v3297_v12 = vld [vmem:[#allocation10 + $0xd8] sm:$0xff] }
 0x8ef   :  { %v2643_v24 = vpop.xlane.xlu1 %2642  ;;  %6270 = vmatprep.subr.bf16.mxu1 %v7960_v40 }
 0x8f0   :  { %v2664_v25 = vmul.f32 1.442695, %v2650_v16  ;;  %v2651_v34 = vsub.f32 %v7659_v39, %v2643_v24  ;;  %6293 = vmatpush3.bf16.msra.mxu0 %v7007_v3  ;;  %v3298_v24 = vld [vmem:[#allocation10 + $0xe0] sm:$0xff] }
 0x8f1   :  { %6294 = vmatprep.subr.bf16.mxu0 %v7960_v40 }
 0x8f2   :  { %6514 = vpow2.f32 %v2664_v25  ;;  %v2666_v35 = vmul.f32 1.442695, %v2651_v34  ;;  %6272 = vmatpush3.bf16.msra.mxu1 %v7013_v10  ;;  %v3299_v25 = vld [vmem:[#allocation10 + $0xe8] sm:$0xff] }
 0x8f3   :  { %6273 = vmatprep.subr.bf16.mxu1 %v7960_v40 }
 0x8f4   :  { %6516 = vpow2.f32 %v2666_v35  ;;  %6296 = vmatpush3.bf16.msra.mxu0 %v7015_v11 }
 0x8f5   :  { %6297 = vmatprep.subr.bf16.mxu0 %v7960_v40 }
 0x8f6   :  { %6275 = vmatpush3.bf16.msra.mxu1 %v7021_v23 }
 0x8f7   :  { %6300 = vmatprep.subr.bf16.mxu1 %v7960_v40 }
 0x8f8   :  { %6299 = vmatpush3.bf16.msra.mxu0 %v7023_v28 }
 0x8f9   :  { %6324 = vmatprep.subr.bf16.mxu0 %v7960_v40 }
 0x8fc   :  { %v7718_v46 = vpop.eup %6514 }
 0x8fd   :  { %v2686_v47 = vsel %vm1054_vm2, %v7718_v46, 0.0 }
 0x8fe   :  { %v7722_v54 = vpop.eup %6516  ;;  %2687 = vadd.xlane.f32.xlu0 %v2686_v47  ;;  %v6415_v47 = vpack.c.bf16 %v3299_v25, %v3298_v24 }
 0x8ff   :  { %v2689_v55 = vsel %vm1054_vm2, %v7722_v54, 0.0 }
 0x900   :  { %2690 = vadd.xlane.f32.xlu1 %v2689_v55 }
 0x90b   :  { %v2676_v2 = vpop.xlane.xlu0 %2675 }
 0x90c   :  { %6518 = vrcp.f32 %v2676_v2  ;;  %v3300_v2 = vld [vmem:[#allocation10 + $0xf0] sm:$0xff] }
 0x90d   :  { %v2679_v3 = vpop.xlane.xlu1 %2678 }
 0x90e   :  { %6520 = vrcp.f32 %v2679_v3  ;;  %v3301_v3 = vld [vmem:[#allocation10 + $0xf8] sm:$0xff] }
 0x916   :  { %v6519_v10 = vpop.eup %6518 }
 0x917   :  { %v2702_v11 = vmul.f32 %v6519_v10, %v7663_v27 }
 0x918   :  { %v6521_v23 = vpop.eup %6520 }
 0x919   :  { %5253 = vmatmul.mubr.f32.vlgmr.msra.gmra.mrb[30].mxu1 %v2702_v11  ;;  %v3478_v28 = vrot.slane %v2702_v11, 6  ;;  %v2703_v26 = vmul.f32 %v6521_v23, %v7667_v43  ;;  %v6418_v11 = vpack.c.bf16 %v3301_v3, %v3300_v2  ;;  %v3269_v23 = vld [vmem:[#allocation8 + $0x80] sm:$0xff] }
 0x91a   :  { %6302 = vmatpush3.bf16.msra.mxu1 %v7029_v37  ;;  %5322 = vmatprep.mubr.msk.f32.mxu1 %vm6732_vm0, %v7943_v52 }
 0x91b   :  { %5288 = vmatmul.mubr.f32.vlgmr.msra.gmra.mrb[30].mxu0 %v2703_v26  ;;  %v3480_v61 = vrot.slane %v2703_v26, 5  ;;  %6303 = vmatprep.subr.bf16.mxu1 %v7960_v40  ;;  %v3479_v1 = vsel %vm1817_vm4, %v3478_v28, %v3477_v7  ;;  %v3296_v7 = vld [vmem:[#allocation10 + $0xd0] sm:$0xff]  ;;  %v3270_v28 = vld [vmem:[#allocation8 + $0x88] sm:$0xff] }
 0x91c   :  { %6326 = vmatpush3.bf16.msra.mxu0 %v7033_v42  ;;  %5357 = vmatprep.mubr.msk.f32.mxu0 %vm6732_vm0, %v7943_v52  ;;  %v6412_v16 = vpack.c.bf16 %v3297_v12, %v3296_v7  ;;  %v6421_v26 = vpack.c.bf16 %v3270_v28, %v3269_v23 }
 0x91d   :  { %6327 = vmatprep.subr.bf16.mxu0 %v7960_v40  ;;  %v3481_v39 = vsel %vm1820_vm5, %v3480_v61, %v3479_v1  ;;  %v3271_v61 = vld [vmem:[#allocation8 + $0x90] sm:$0xff]  ;;  %v3272_v1 = vld [vmem:[#allocation8 + $0x98] sm:$0xff] }
 0x91e   :  { %6305 = vmatpush3.bf16.msra.mxu1 %v7045_v17 }
 0x91f   :  { %6306 = vmatprep.subr.bf16.mxu1 %v7960_v40 }
 0x920   :  { %6329 = vmatpush3.bf16.msra.mxu0 %v7047_v58 }
 0x921   :  { %6330 = vmatprep.subr.bf16.mxu0 %v7960_v40 }
 0x922   :  { %6308 = vmatpush3.bf16.msra.mxu1 %v7053_v6 }
 0x923   :  { %6309 = vmatprep.subr.bf16.mxu1 %v7960_v40 }
 0x924   :  { %6332 = vmatpush3.bf16.msra.mxu0 %v7055_v8 }
 0x925   :  { %6333 = vmatprep.subr.bf16.mxu0 %v7960_v40 }
 0x926   :  { %6311 = vmatpush3.bf16.msra.mxu1 %v7061_v22 }
 0x927   :  { %6312 = vmatprep.subr.bf16.mxu1 %v7960_v40 }
 0x928   :  { %6335 = vmatpush3.bf16.msra.mxu0 %v7063_v29 }
 0x929   :  { %6336 = vmatprep.subr.bf16.mxu0 %v7960_v40 }
 0x92a   :  { %6314 = vmatpush3.bf16.msra.mxu1 %v7069_v48  ;;  %v7996_v48 = vld [vmem:[#allocation40_spill] sm:$0xff] }
 0x92b   :  { %6315 = vmatprep.subr.bf16.mxu1 %v7960_v40 }
 0x92c   :  { %6338 = vmatpush3.bf16.msra.mxu0 %v7071_v49  ;;  %v7997_v49 = vld [vmem:[#allocation41_spill] sm:$0xff] }
 0x92d   :  { %6339 = vmatprep.subr.bf16.mxu0 %v7960_v40 }
 0x92e   :  { %6317 = vmatpush3.bf16.msra.mxu1 %v7077_v62  ;;  %v7998_v62 = vld [vmem:[#allocation42_spill] sm:$0xff] }
 0x92f   :  { %6318 = vmatprep.subr.bf16.mxu1 %v7960_v40 }
 0x930   :  { %6341 = vmatpush3.bf16.msra.mxu0 %v7079_v63  ;;  %v7999_v63 = vld [vmem:[#allocation43_spill] sm:$0xff] }
 0x931   :  { %6342 = vmatprep.subr.bf16.mxu0 %v7960_v40 }
 0x932   :  { %6320 = vmatpush3.bf16.msra.mxu1 %v7085_v19  ;;  %v8000_v19 = vld [vmem:[#allocation44_spill] sm:$0xff] }
 0x933   :  { %6321 = vmatprep.subr.bf16.mxu1 %v7960_v40 }
 0x934   :  { %6344 = vmatpush3.bf16.msra.mxu0 %v7087_v30  ;;  %v8001_v30 = vld [vmem:[#allocation45_spill] sm:$0xff] }
 0x935   :  { %6345 = vmatprep.subr.bf16.mxu0 %v7960_v40 }
 0x936   :  { %6323 = vmatpush3.bf16.msra.mxu1 %v7095_v53 }
 0x937   :  { %6348 = vmatprep.subr.bf16.mxu1 %v7960_v40 }
 0x938   :  { %6347 = vmatpush3.bf16.msra.mxu0 %v7097_v59 }
 0x939   :  { %6372 = vmatprep.subr.bf16.mxu0 %v7960_v40 }
 0x94b   :  { %v2682_v37 = vpop.xlane.xlu0 %2681 }
 0x94c   :  { %6522 = vrcp.f32 %v2682_v37  ;;  %v6424_v37 = vpack.c.bf16 %v3272_v1, %v3271_v61 }
 0x94d   :  { %v2685_v42 = vpop.xlane.xlu1 %2684 }
 0x94e   :  { %6524 = vrcp.f32 %v2685_v42  ;;  %v3273_v42 = vld [vmem:[#allocation8 + $0xa0] sm:$0xff] }
 0x956   :  { %v6523_v17 = vpop.eup %6522 }
 0x957   :  { %v2704_v58 = vmul.f32 %v6523_v17, %v7671_v41  ;;  %v3291_v41 = vld [vmem:[#allocation10 + $0xa8] sm:$0xff] }
 0x958   :  { %v6525_v6 = vpop.eup %6524  ;;  %v6403_v21 = vpack.c.bf16 %v3291_v41, %v3290_v60  ;;  %v3274_v17 = vld [vmem:[#allocation8 + $0xa8] sm:$0xff] }
 0x959   :  { %5323 = vmatmul.mubr.f32.vlgmr.msra.gmra.mrb[32].mxu1 %v2704_v58  ;;  %v3482_v8 = vrot.slane %v2704_v58, 4  ;;  %v2705_v22 = vmul.f32 %v6525_v6, %v7675_v15  ;;  %v6427_v58 = vpack.c.bf16 %v3274_v17, %v3273_v42  ;;  %v3275_v6 = vld [vmem:[#allocation8 + $0xb0] sm:$0xff] }
 0x95a   :  { %6350 = vmatpush3.bf16.msra.mxu1 %v7961_v20  ;;  %5392 = vmatprep.mubr.msk.f32.mxu1 %vm6732_vm0, %v7943_v52  ;;  %v3286_v20 = vld [vmem:[#allocation10 + $0x80] sm:$0xff] }
 0x95b   :  { %5358 = vmatmul.mubr.f32.vlgmr.msra.gmra.mrb[32].mxu0 %v2705_v22  ;;  %6351 = vmatprep.subr.bf16.mxu1 %v7960_v40  ;;  %v3483_v29 = vsel %vm1823_vm6, %v3482_v8, %v3481_v39  ;;  %v8002_v39 = vld [vmem:[#allocation34_spill] sm:$0xff]  ;;  %v3276_v8 = vld [vmem:[#allocation8 + $0xb8] sm:$0xff] }
 0x95c   :  { %6374 = vmatpush3.bf16.msra.mxu0 %v7962_v0  ;;  %5427 = vmatprep.mubr.msk.f32.mxu0 %vm6732_vm0, %v7943_v52  ;;  %v3287_v0 = vld [vmem:[#allocation10 + $0x88] sm:$0xff] }
 0x95d   :  { %6375 = vmatprep.subr.bf16.mxu0 %v7960_v40 }
 0x95e   :  { %6353 = vmatpush3.bf16.msra.mxu1 %v7963_v56 }
 0x95f   :  { %6354 = vmatprep.subr.bf16.mxu1 %v7960_v40 }
 0x960   :  { %6377 = vmatpush3.bf16.msra.mxu0 %v7964_v38  ;;  %v3484_v38 = vrot.slane %v2705_v22, 3  ;;  %v6430_v22 = vpack.c.bf16 %v3276_v8, %v3275_v6 }
 0x961   :  { %6378 = vmatprep.subr.bf16.mxu0 %v7960_v40 }
 0x962   :  { %6356 = vmatpush3.bf16.msra.mxu1 %v7965_v14  ;;  %v6397_v14 = vpack.c.bf16 %v3287_v0, %v3286_v20  ;;  %v3485_v51 = vsel %vm1826_vm7, %v3484_v38, %v3483_v29  ;;  %v3277_v29 = vld [vmem:[#allocation8 + $0xc0] sm:$0xff]  ;;  %v3284_v38 = vld [vmem:[#allocation8 + $0xf8] sm:$0xff] }
 0x963   :  { %6357 = vmatprep.subr.bf16.mxu1 %v7960_v40 }
 0x964   :  { %6380 = vmatpush3.bf16.msra.mxu0 %v7966_v5 }
 0x965   :  { %6381 = vmatprep.subr.bf16.mxu0 %v7960_v40 }
 0x966   :  { %6359 = vmatpush3.bf16.msra.mxu1 %v7996_v48  ;;  %v3278_v48 = vld [vmem:[#allocation8 + $0xc8] sm:$0xff] }
 0x967   :  { %6360 = vmatprep.subr.bf16.mxu1 %v7960_v40 }
 0x968   :  { %6383 = vmatpush3.bf16.msra.mxu0 %v7997_v49  ;;  %v6433_v49 = vpack.c.bf16 %v3278_v48, %v3277_v29 }
 0x969   :  { %6384 = vmatprep.subr.bf16.mxu0 %v7960_v40 }
 0x96a   :  { %6362 = vmatpush3.bf16.msra.mxu1 %v7998_v62  ;;  %v3280_v62 = vld [vmem:[#allocation8 + $0xd8] sm:$0xff] }
 0x96b   :  { %6363 = vmatprep.subr.bf16.mxu1 %v7960_v40 }
 0x96c   :  { %6386 = vmatpush3.bf16.msra.mxu0 %v7999_v63 }
 0x96d   :  { %6387 = vmatprep.subr.bf16.mxu0 %v7960_v40 }
 0x96e   :  { %6365 = vmatpush3.bf16.msra.mxu1 %v8000_v19  ;;  %v3281_v19 = vld [vmem:[#allocation8 + $0xe0] sm:$0xff] }
 0x96f   :  { %6366 = vmatprep.subr.bf16.mxu1 %v7960_v40 }
 0x970   :  { %6389 = vmatpush3.bf16.msra.mxu0 %v8001_v30  ;;  %v3282_v30 = vld [vmem:[#allocation8 + $0xe8] sm:$0xff] }
 0x971   :  { %6390 = vmatprep.subr.bf16.mxu0 %v7960_v40 }
 0x972   :  { %6368 = vmatpush3.bf16.msra.mxu1 %v7991_v4  ;;  %v3288_v4 = vld [vmem:[#allocation10 + $0x90] sm:$0xff] }
 0x973   :  { %6369 = vmatprep.subr.bf16.mxu1 %v7960_v40 }
 0x974   :  { %6392 = vmatpush3.bf16.msra.mxu0 %v7992_v31  ;;  %v3289_v31 = vld [vmem:[#allocation10 + $0x98] sm:$0xff] }
 0x975   :  { %6393 = vmatprep.subr.bf16.mxu0 %v7960_v40 }
 0x976   :  { %6371 = vmatpush3.bf16.msra.mxu1 %v7993_v44 }
 0x977   :  { %6396 = vmatprep.subr.bf16.mxu1 %v7960_v40 }
 0x978   :  { %6395 = vmatpush3.bf16.msra.mxu0 %v7994_v9  ;;  %v6400_v9 = vpack.c.bf16 %v3289_v31, %v3288_v4 }
 0x98b   :  { %v2688_v53 = vpop.xlane.xlu0 %2687 }
 0x98c   :  { %6526 = vrcp.f32 %v2688_v53  ;;  %v6439_v53 = vpack.c.bf16 %v3282_v30, %v3281_v19 }
 0x98d   :  { %v2691_v59 = vpop.xlane.xlu1 %2690 }
 0x98e   :  { %6528 = vrcp.f32 %v2691_v59 }
 0x996   :  { %v6527_v56 = vpop.eup %6526 }
 0x997   :  { %v2706_v5 = vmul.f32 %v6527_v56, %v7718_v46  ;;  %v3283_v56 = vld [vmem:[#allocation8 + $0xf0] sm:$0xff] }
 0x998   :  { %v6529_v27 = vpop.eup %6528 }
 0x999   :  { %5393 = vmatmul.mubr.f32.vlgmr.msra.gmra.mrb[34].mxu1 %v2706_v5  ;;  %v2707_v44 = vmul.f32 %v6529_v27, %v7722_v54  ;;  %v3486_v43 = vrot.slane %v2706_v5, 2  ;;  %v6442_v5 = vpack.c.bf16 %v3284_v38, %v3283_v56 }
 0x99a   :  { %6398 = vmatpush3.bf16.msra.mxu1 %v6397_v14  ;;  %5462 = vmatprep.mubr.msk.f32.mxu1 %vm6732_vm0, %v7943_v52 }
 0x99b   :  { %5428 = vmatmul.mubr.f32.vlgmr.msra.gmra.mrb[34].mxu0 %v2707_v44  ;;  %6399 = vmatprep.subr.bf16.mxu1 %v7960_v40  ;;  %v3487_v50 = vsel %vm1829_vm8, %v3486_v43, %v3485_v51  ;;  %v3488_v15 = vrot.slane %v2707_v44, 1 }
 0x99d   :  { %v3489_v32 = vsel %vm1832_vm9, %v3488_v15, %v3487_v50 }
 0x99e   :  { %6401 = vmatpush3.bf16.msra.mxu1 %v6400_v9  ;;  %3491 = vst [vmem:[#allocation14] sm:$0xff] %v3489_v32 }
 0x99f   :  { %6402 = vmatprep.subr.bf16.mxu1 %v7960_v40 }
 0x9a2   :  { %6404 = vmatpush3.bf16.msra.mxu1 %v6403_v21 }
 0x9a3   :  { %6405 = vmatprep.subr.bf16.mxu1 %v7960_v40 }
 0x9a6   :  { %6407 = vmatpush3.bf16.msra.mxu1 %v6406_v33 }
 0x9a7   :  { %6408 = vmatprep.subr.bf16.mxu1 %v7960_v40 }
 0x9aa   :  { %6410 = vmatpush3.bf16.msra.mxu1 %v6409_v36 }
 0x9ab   :  { %6411 = vmatprep.subr.bf16.mxu1 %v7960_v40 }
 0x9ac   :  { %v2774_v34 = vpop.f32.mrb[28].mxu1 }
 0x9ad   :  { %v5184_v35 = vpop.f32.mrb[29].mxu1 }
 0x9ae   :  { %6413 = vmatpush3.bf16.msra.mxu1 %v6412_v16  ;;  %v2844_v46 = vpop.f32.mrb[28].mxu0 }
 0x9af   :  { %v3380_v54 = vrot.slane %v2844_v46, 7  ;;  %v5219_v55 = vpop.f32.mrb[29].mxu0  ;;  %6414 = vmatprep.subr.bf16.mxu1 %v7960_v40 }
 0x9b1   :  { %v3381_v10 = vsel %vm1814_vm3, %v3380_v54, %v2774_v34 }
 0x9b2   :  { %6416 = vmatpush3.bf16.msra.mxu1 %v6415_v47 }
 0x9b3   :  { %6417 = vmatprep.subr.bf16.mxu1 %v7960_v40 }
 0x9b6   :  { %6419 = vmatpush3.bf16.msra.mxu1 %v6418_v11 }
 0x9b7   :  { %6420 = vmatprep.subr.bf16.mxu1 %v7960_v40 }
 0x9b9   :  { %5463 = vmatmul.mubr.f32.vlgmr.msra.gmra.mrb[36].mxu1 %v8002_v39 }
 0x9ba   :  { %6422 = vmatpush3.bf16.msra.mxu1 %v6421_v26  ;;  %5497 = vmatprep.mubr.msk.f32.mxu1 %vm6732_vm0, %v7943_v52  ;;  %v3279_v52 = vld [vmem:[#allocation8 + $0xd0] sm:$0xff] }
 0x9bb   :  { %6423 = vmatprep.subr.bf16.mxu1 %v7960_v40  ;;  %v6436_v63 = vpack.c.bf16 %v3280_v62, %v3279_v52 }
 0x9be   :  { %6425 = vmatpush3.bf16.msra.mxu1 %v6424_v37 }
 0x9bf   :  { %6426 = vmatprep.subr.bf16.mxu1 %v7960_v40 }
 0x9c2   :  { %6428 = vmatpush3.bf16.msra.mxu1 %v6427_v58 }
 0x9c3   :  { %6429 = vmatprep.subr.bf16.mxu1 %v7960_v40 }
 0x9c6   :  { %6431 = vmatpush3.bf16.msra.mxu1 %v6430_v22 }
 0x9c7   :  { %6432 = vmatprep.subr.bf16.mxu1 %v7960_v40 }
 0x9ca   :  { %6434 = vmatpush3.bf16.msra.mxu1 %v6433_v49 }
 0x9cb   :  { %6435 = vmatprep.subr.bf16.mxu1 %v7960_v40 }
 0x9ce   :  { %6437 = vmatpush3.bf16.msra.mxu1 %v6436_v63 }
 0x9cf   :  { %6438 = vmatprep.subr.bf16.mxu1 %v7960_v40 }
 0x9d2   :  { %6440 = vmatpush3.bf16.msra.mxu1 %v6439_v53 }
 0x9d3   :  { %6441 = vmatprep.subr.bf16.mxu1 %v7960_v40 }
 0x9d6   :  { %6443 = vmatpush3.bf16.msra.mxu1 %v6442_v5 }
 0x9ec   :  { %v2914_v59 = vpop.f32.mrb[30].mxu1 }
 0x9ed   :  { %v3382_v20 = vrot.slane %v2914_v59, 6  ;;  %v5254_v0 = vpop.f32.mrb[31].mxu1 }
 0x9ee   :  { %v2984_v14 = vpop.f32.mrb[30].mxu0 }
 0x9ef   :  { %v3383_v4 = vsel %vm1817_vm4, %v3382_v20, %v3381_v10  ;;  %v3384_v31 = vrot.slane %v2984_v14, 5  ;;  %v5289_v27 = vpop.f32.mrb[31].mxu0 }
 0x9f1   :  { %v3385_v44 = vsel %vm1820_vm5, %v3384_v31, %v3383_v4 }
 0xa2c   :  { %v3054_v43 = vpop.f32.mrb[32].mxu1 }
 0xa2d   :  { %v3386_v9 = vrot.slane %v3054_v43, 4  ;;  %v5324_v51 = vpop.f32.mrb[33].mxu1 }
 0xa2e   :  { %v3124_v60 = vpop.f32.mrb[32].mxu0 }
 0xa2f   :  { %v3387_v40 = vsel %vm1823_vm6, %v3386_v9, %v3385_v44  ;;  %v3388_v41 = vrot.slane %v3124_v60, 3  ;;  %v5359_v50 = vpop.f32.mrb[33].mxu0 }
 0xa31   :  { %v3389_v15 = vsel %vm1826_vm7, %v3388_v41, %v3387_v40 }
 0xa6c   :  { %v3194_v32 = vpop.f32.mrb[34].mxu1 }
 0xa6d   :  { %v3390_v21 = vrot.slane %v3194_v32, 2  ;;  %v5394_v13 = vpop.f32.mrb[35].mxu1 }
 0xa6e   :  { %v3264_v57 = vpop.f32.mrb[34].mxu0 }
 0xa6f   :  { %v3391_v33 = vsel %vm1829_vm8, %v3390_v21, %v3389_v15  ;;  %v3392_v45 = vrot.slane %v3264_v57, 1  ;;  %v5429_v18 = vpop.f32.mrb[35].mxu0 }
 0xa71   :  { %v3393_v36 = vsel %vm1832_vm9, %v3392_v45, %v3391_v33 }
 0xa72   :  { %5498 = vmatmul.mubr.f32.vlgmr.msra.gmra.mrb[36].mxu1 %v3393_v36 }
 0xa73   :  { %6676 = shalt.err (!%p6673_p10)
}
 0xa74   :  { %s6677_s28 = scalar_lea.hbm %s7868_s7, 128 }
 0xa75   :  { %p6678_p11 = scmp.ne.s32.totalorder %s7868_s7, %s6677_s28  ;;  %p6681_p12 = scmp.lt.u32.totalorder %s6677_s28, %s7868_s7 }
 0xa77   :  { %p6683_p13 = pnand %p6681_p12, %p6678_p11 }
 0xa79   :  { %6686 = shalt.err (!%p6683_p13)
}
 0xa7a   :  { %3511 = dma.vmem_to_hbm [thread:$0]  %s3509_s25, 128, %s7868_s7, [#allocation15]   ;;  %v8003_v12 = vld [vmem:[#allocation33_spill] sm:$0xff] }
 0xa7b   :  { %s6736_s14 = smov [#allocation13]  }
 0xa7c   :  { %s3498_s2 = sshll.u32 %s6736_s14, 4  ;;  %s3499_s2 = int_to_ptr.vmem [resolvable:$true] %s3498_s2 }
 0xa7d   :  { %s6687_s3 = scalar_lea.vmem %s3499_s2, 128  ;;  %p6692_p1 = scmp.lt.s32.totalorder %s3499_s2, %s3499_s2 }
 0xa7e   :  { %p6688_p0 = scmp.ne.s32.totalorder %s3499_s2, %s6687_s3  ;;  %p6693_p2 = scmp.lt.s32.totalorder %s6687_s3, %s6687_s3 }
 0xa80   :  { %p6694_p3 = por %p6693_p2, %p6692_p1 }
 0xa82   :  { %p6695_p4 = pnand %p6694_p3, %p6688_p0 }
 0xb45   :  { %v3461_v7 = vpop.f32.mrb[36].mxu1 }
 0xb46   :  { %v3465_v16 = vadd.f32 %v3461_v7, %v8003_v12  ;;  %v5499_v24 = vpop.f32.mrb[37].mxu1 }
 0xb48   :  { %6530 = vtanh.f32 %v3465_v16 }
 0xb52   :  { %v6531_v25 = vpop.eup %6530 }
 0xb53   :  { %3467 = vst [vmem:[#allocation13] sm:$0xff] %v6531_v25 }
 0xb54   :  { %6698 = shalt.err (!%p6695_p4)
}
 0xb55   :  { %s6699_s7 = scalar_lea.hbm %s7867_s6, 128 }
 0xb56   :  { %p6700_p5 = scmp.ne.s32.totalorder %s7867_s6, %s6699_s7  ;;  %p6703_p6 = scmp.lt.u32.totalorder %s6699_s7, %s7867_s6 }
 0xb58   :  { %p6705_p7 = pnand %p6703_p6, %p6700_p5 }
 0xb5a   :  { %6708 = shalt.err (!%p6705_p7)
}
 0xb5b   :  { %3501 = dma.vmem_to_hbm [thread:$0]  %s3499_s2, 128, %s7867_s6, [#allocation4]  }
 0xb5c   :  { %6717 = dma.done.wait [#allocation4], 128  }
 0xb5d   :  { %6718 = vsyncadd [#allocation4], 4294967168 }
 0xb5e   :  { %6719 = dma.done.wait [#allocation15], 128  }
 0xb5f   :  { %6720 = vsyncadd [#allocation15], 4294967168 }
 0xb60   :  { %3518 = vsyncpa [#allocation3], 1 }
 0xb61   :  { %3519 = vsyncpa [#allocation6], 1 }
 0xb62   :  { %3520 = vsyncpa [#allocation9], 1 }
 0xb63   :  { %3521 = vsyncpa [#allocation12], 1 }
 0xb64   :  { %3522 = vsyncpa [#allocation4], 1 }
 0xb65   :  { %3523 = vsyncpa [#allocation15], 1 }

</bundles_post_ra>
